<compile_context>
chip_gen: v5e
topology: v5e:2x2
jax: 0.10.0
libtpu: 0.0.40
codegen_flags: <defaults>
</compile_context>

<pallas_src>
import jax
import jax.numpy as jnp
from jax.experimental import pallas as pl
from jax.experimental.pallas import tpu as pltpu


LN_EPS = 1e-5  # torch.nn.LayerNorm default


def _round_up(x, m):
    return (x + m - 1) // m * m


def _num_tensorcores_per_chip():
    """2 on dual-TensorCore chips (v4 / v5p / v7x), else 1."""
    try:
        kind = jax.devices()[0].device_kind.lower()
    except Exception:
        return 1
    return 2 if any(tag in kind for tag in ("v4", "v5p", "v7", "7x")) else 1


def _vmem_capacity_bytes():
    try:
        cap = getattr(pltpu.get_tpu_info(), "vmem_capacity_bytes", None)
        if cap:
            return int(cap)
    except Exception:
        pass
    return 64 << 20  # conservative default (v7x per-TensorCore VMEM)


def _projection_head_kernel(x_ref, w1_ref, w2_ref, p_ref, o_ref):
    # ---- Linear 1: f32->bf16 cast in-kernel (VPU cast hides under MXU) ----
    x_bf = x_ref[...].astype(jnp.bfloat16)
    h = jnp.dot(x_bf, w1_ref[...], preferred_element_type=jnp.float32)
    h = h + p_ref[0:1, :]                                    # b1

    # ---- GELU (exact erf, matches torch.nn.GELU default), f32 ----
    h = 0.5 * h * (1.0 + jax.lax.erf(h * jnp.float32(0.7071067811865476)))

    # ---- Linear 2: bf16 operands, f32 MXU accumulation ----
    y = jnp.dot(h.astype(jnp.bfloat16), w2_ref[...],
                preferred_element_type=jnp.float32)
    y = y + p_ref[1:2, :]                                    # b2

    # ---- Dropout: identity in eval/inference mode ----
    # TODO(synk): training-mode stochastic dropout (pltpu.prng_*) intentionally omitted.

    # ---- LayerNorm over last dim: two-pass (centered) stats, row-local ----
    mean = jnp.mean(y, axis=-1, keepdims=True)
    d = y - mean
    var = jnp.mean(d * d, axis=-1, keepdims=True)
    y_hat = d * jax.lax.rsqrt(var + jnp.float32(LN_EPS))
    o_ref[...] = (y_hat * p_ref[2:3, :] + p_ref[3:4, :]).astype(o_ref.dtype)


def prepare_projection_head_params(w1, b1, w2, b2, gamma, beta):
    """One-time weight prep: bf16 matmul weights + packed (4, N) f32 params.

    Call once at model init and reuse on every forward — keeps the per-call
    HBM re-cast of static weights out of the hot path.
    """
    K, N = w1.shape
    assert w2.shape == (N, N)
    assert b1.shape == (N,) and b2.shape == (N,)
    assert gamma.shape == (N,) and beta.shape == (N,)
    w1_bf = jnp.asarray(w1, jnp.bfloat16)
    w2_bf = jnp.asarray(w2, jnp.bfloat16)
    params = jnp.stack(
        [jnp.asarray(b1, jnp.float32),
         jnp.asarray(b2, jnp.float32),
         jnp.asarray(gamma, jnp.float32),
         jnp.asarray(beta, jnp.float32)], axis=0)            # (4, N): b1,b2,gamma,beta
    return w1_bf, w2_bf, params


def projection_head(x, prepared, *, tile_m=None, out_dtype=jnp.float32):
    """x: (B, input_dim) -> (B, projection_dim) in `out_dtype` (f32 default)."""
    w1_bf, w2_bf, params = prepared
    B, K = x.shape
    K_w, N = w1_bf.shape
    assert K_w == K
    assert N % 128 == 0, "projection_dim must be a multiple of 128 (lane-dense out)"

    num_cores = _num_tensorcores_per_chip()
    vmem_cap = _vmem_capacity_bytes()

    # --- per-generation tile size: big tiles so per-step overhead is amortised ---
    if tile_m is None:
        tile_m = 512 if vmem_cap <= (96 << 20) else 1024     # v7x vs v5e/v6e
    tile_m = max(8, _round_up(min(int(tile_m), _round_up(B, 8)), 8))
    if num_cores >= 2:
        # split across both TensorCores only when it does not inflate padding
        balanced = max(8, _round_up(pl.cdiv(B, num_cores), 8))
        if pl.cdiv(B, balanced) >= num_cores:
            tile_m = min(tile_m, balanced)
    grid_m = pl.cdiv(B, tile_m)   # ragged last block is fine: compute is row-local

    # NOTE: the contraction dim K is fed unpadded — the real model uses K=768
    # (already MXU-aligned); wrapper-side padding would cost an extra HBM pass.

    out_itemsize = jnp.dtype(out_dtype).itemsize

    def run(single_buffer_weights):
        const_kw = {"pipeline_mode": pl.Buffered(1)} if single_buffer_weights else {}
        w_bufs = 1 if single_buffer_weights else 2

        # --- explicit VMEM budget from the actual buffered layout ---
        est = (2 * tile_m * K * 4                    # x tiles (f32, double-buffered)
               + 2 * tile_m * N * out_itemsize       # output tiles
               + w_bufs * (K * N + N * N) * 2        # W1 / W2 (bf16, resident)
               + w_bufs * 4 * N * 4                  # packed b1/b2/gamma/beta
               + 6 * tile_m * N * 4)                 # in-kernel f32 intermediates
        ceiling = min(int(0.6 * vmem_cap), 96 << 20)
        vmem_limit = int(min(max(int(1.5 * est), 8 << 20), ceiling))

        cost = pl.CostEstimate(
            flops=2 * B * N * (K + N) + 8 * B * N,
            transcendentals=B * N,
            bytes_accessed=(B * K * 4 + (K * N + N * N) * 2 + 4 * N * 4
                            + B * N * out_itemsize),
        )

        return pl.pallas_call(
            _projection_head_kernel,
            out_shape=jax.ShapeDtypeStruct((B, N), out_dtype),
            grid_spec=pltpu.PrefetchScalarGridSpec(
                num_scalar_prefetch=0,
                grid=(grid_m,),
                in_specs=[
                    pl.BlockSpec((tile_m, K), lambda i: (i, 0)),         # x tile (f32)
                    pl.BlockSpec((K, N), lambda i: (0, 0), **const_kw),  # W1 (resident)
                    pl.BlockSpec((N, N), lambda i: (0, 0), **const_kw),  # W2 (resident)
                    pl.BlockSpec((4, N), lambda i: (0, 0), **const_kw),  # b1/b2/gamma/beta
                ],
                out_specs=pl.BlockSpec((tile_m, N), lambda i: (i, 0)),
            ),
            compiler_params=pltpu.CompilerParams(
                dimension_semantics=("parallel",),
                vmem_limit_bytes=vmem_limit,
            ),
            cost_estimate=cost,
        )(x, w1_bf, w2_bf, params)

    try:
        return run(single_buffer_weights=True)
    except Exception:
        # pl.Buffered(1) single-buffering unsupported on this build — fall back
        # to default double-buffered weight blocks (identical semantics).
        return run(single_buffer_weights=False)


def _reference(x, w1, b1, w2, b2, gamma, beta):
    """Pure-JAX reference with the same bf16-operand / f32-accumulate numerics."""
    xb = x.astype(jnp.bfloat16).astype(jnp.float32)
    w1b = w1.astype(jnp.bfloat16).astype(jnp.float32)
    w2b = w2.astype(jnp.bfloat16).astype(jnp.float32)
    h = xb @ w1b + b1
    h = 0.5 * h * (1.0 + jax.lax.erf(h * jnp.float32(0.7071067811865476)))
    h = h.astype(jnp.bfloat16).astype(jnp.float32)
    y = h @ w2b + b2
    mean = jnp.mean(y, axis=-1, keepdims=True)
    var = jnp.mean((y - mean) ** 2, axis=-1, keepdims=True)
    return (y - mean) / jnp.sqrt(var + LN_EPS) * gamma + beta


if __name__ == "__main__":
    # Small shapes consistent with the module (real model: input_dim=768, proj_dim=768).
    B, INPUT_DIM, PROJ_DIM = 16, 48, 256

    key = jax.random.PRNGKey(0)
    kx, kw1, kb1, kw2, kb2 = jax.random.split(key, 5)

    x = jax.random.normal(kx, (B, INPUT_DIM), dtype=jnp.float32)
    w1 = jax.random.normal(kw1, (INPUT_DIM, PROJ_DIM), jnp.float32) * (1.0 / INPUT_DIM ** 0.5)
    b1 = jax.random.normal(kb1, (PROJ_DIM,), jnp.float32) * 0.01
    w2 = jax.random.normal(kw2, (PROJ_DIM, PROJ_DIM), jnp.float32) * (1.0 / PROJ_DIM ** 0.5)
    b2 = jax.random.normal(kb2, (PROJ_DIM,), jnp.float32) * 0.01
    gamma = jnp.ones((PROJ_DIM,), jnp.float32)
    beta = jnp.zeros((PROJ_DIM,), jnp.float32)

    # One-time weight preparation (hoisted out of the per-call hot path).
    prepared = prepare_projection_head_params(w1, b1, w2, b2, gamma, beta)

    out = projection_head(x, prepared)
    jax.block_until_ready(out)

    ref = _reference(x, w1, b1, w2, b2, gamma, beta)
    assert out.shape == (B, PROJ_DIM)
    max_diff = float(jnp.max(jnp.abs(out - ref)))
    assert jnp.allclose(out, ref, atol=5e-3, rtol=5e-3), f"max abs diff = {max_diff}"

    print("KERNEL_OK")
</pallas_src>

<mosaic_0001>
module attributes {stable_mosaic.version = 11 : i64} {
  func.func @_projection_head_kernel(%arg0: i32, %arg1: memref<16x48xf32, #tpu.memory_space<vmem>>, %arg2: memref<48x256xbf16, #tpu.memory_space<vmem>>, %arg3: memref<256x256xbf16, #tpu.memory_space<vmem>>, %arg4: memref<4x256xf32, #tpu.memory_space<vmem>>, %arg5: memref<16x256xf32, #tpu.memory_space<vmem>>) attributes {dimension_semantics = [#tpu.dimension_semantics<parallel>], iteration_bounds = array<i64: 1>, scalar_prefetch = 0 : i64, scratch_operands = 0 : i64, tpu.core_type = #tpu.core_type<tc>, window_params = [{transform_indices = @transform_0, window_bounds = array<i64: 16, 48>}, {pipeline_mode = #tpu.pipeline_mode<synchronous>, transform_indices = @transform_1, window_bounds = array<i64: 48, 256>}, {pipeline_mode = #tpu.pipeline_mode<synchronous>, transform_indices = @transform_2, window_bounds = array<i64: 256, 256>}, {pipeline_mode = #tpu.pipeline_mode<synchronous>, transform_indices = @transform_3, window_bounds = array<i64: 4, 256>}, {transform_indices = @transform_4, window_bounds = array<i64: 16, 256>}]} {
    %c0 = arith.constant 0 : index
    %c0_0 = arith.constant 0 : index
    %0 = vector.load %arg1[%c0, %c0_0] : memref<16x48xf32, #tpu.memory_space<vmem>>, vector<16x48xf32>
    %1 = arith.truncf %0 : vector<16x48xf32> to vector<16x48xbf16>
    %c0_1 = arith.constant 0 : index
    %c0_2 = arith.constant 0 : index
    %2 = vector.load %arg2[%c0_1, %c0_2] : memref<48x256xbf16, #tpu.memory_space<vmem>>, vector<48x256xbf16>
    %cst = arith.constant dense<0.000000e+00> : vector<16x256xf32>
    %3 = tpu.matmul %1, %2, %cst {dimension_numbers = #tpu.dot_dimension_numbers<[1], [0], [0], [1], [0, 0, 1, 1], [], []>} : vector<16x48xbf16>, vector<48x256xbf16>, vector<16x256xf32> -> vector<16x256xf32>
    %c0_3 = arith.constant 0 : index
    %c0_4 = arith.constant 0 : index
    %4 = vector.load %arg4[%c0_3, %c0_4] : memref<4x256xf32, #tpu.memory_space<vmem>>, vector<1x256xf32>
    %5 = vector.broadcast %4 : vector<1x256xf32> to vector<16x256xf32>
    %6 = arith.addf %3, %5 : vector<16x256xf32>
    %cst_5 = arith.constant 5.000000e-01 : f32
    %7 = vector.broadcast %cst_5 : f32 to vector<16x256xf32>
    %8 = arith.mulf %7, %6 : vector<16x256xf32>
    %cst_6 = arith.constant 0.707106769 : f32
    %9 = vector.broadcast %cst_6 : f32 to vector<16x256xf32>
    %10 = arith.mulf %6, %9 : vector<16x256xf32>
    %11 = math.erf %10 : vector<16x256xf32>
    %cst_7 = arith.constant 1.000000e+00 : f32
    %12 = vector.broadcast %cst_7 : f32 to vector<16x256xf32>
    %13 = arith.addf %12, %11 : vector<16x256xf32>
    %14 = arith.mulf %8, %13 : vector<16x256xf32>
    %15 = arith.truncf %14 : vector<16x256xf32> to vector<16x256xbf16>
    %c0_8 = arith.constant 0 : index
    %c0_9 = arith.constant 0 : index
    %16 = vector.load %arg3[%c0_8, %c0_9] : memref<256x256xbf16, #tpu.memory_space<vmem>>, vector<256x256xbf16>
    %cst_10 = arith.constant dense<0.000000e+00> : vector<16x256xf32>
    %17 = tpu.matmul %15, %16, %cst_10 {dimension_numbers = #tpu.dot_dimension_numbers<[1], [0], [0], [1], [0, 0, 1, 1], [], []>} : vector<16x256xbf16>, vector<256x256xbf16>, vector<16x256xf32> -> vector<16x256xf32>
    %c1 = arith.constant 1 : index
    %c0_11 = arith.constant 0 : index
    %18 = vector.load %arg4[%c1, %c0_11] : memref<4x256xf32, #tpu.memory_space<vmem>>, vector<1x256xf32>
    %19 = vector.broadcast %18 : vector<1x256xf32> to vector<16x256xf32>
    %20 = arith.addf %17, %19 : vector<16x256xf32>
    %cst_12 = arith.constant dense<0.000000e+00> : vector<16xf32>
    %21 = vector.multi_reduction <add>, %20, %cst_12 [1] : vector<16x256xf32> to vector<16xf32>
    %22 = vector.shape_cast %21 : vector<16xf32> to vector<16x1xf32>
    %cst_13 = arith.constant 2.560000e+02 : f32
    %23 = vector.broadcast %cst_13 : f32 to vector<16x1xf32>
    %24 = arith.divf %22, %23 : vector<16x1xf32>
    %25 = vector.broadcast %24 : vector<16x1xf32> to vector<16x256xf32>
    %26 = arith.subf %20, %25 : vector<16x256xf32>
    %27 = arith.mulf %26, %26 : vector<16x256xf32>
    %cst_14 = arith.constant dense<0.000000e+00> : vector<16xf32>
    %28 = vector.multi_reduction <add>, %27, %cst_14 [1] : vector<16x256xf32> to vector<16xf32>
    %29 = vector.shape_cast %28 : vector<16xf32> to vector<16x1xf32>
    %cst_15 = arith.constant 2.560000e+02 : f32
    %30 = vector.broadcast %cst_15 : f32 to vector<16x1xf32>
    %31 = arith.divf %29, %30 : vector<16x1xf32>
    %cst_16 = arith.constant 9.99999974E-6 : f32
    %32 = vector.broadcast %cst_16 : f32 to vector<16x1xf32>
    %33 = arith.addf %31, %32 : vector<16x1xf32>
    %34 = math.rsqrt %33 : vector<16x1xf32>
    %35 = vector.broadcast %34 : vector<16x1xf32> to vector<16x256xf32>
    %36 = arith.mulf %26, %35 : vector<16x256xf32>
    %c2 = arith.constant 2 : index
    %c0_17 = arith.constant 0 : index
    %37 = vector.load %arg4[%c2, %c0_17] : memref<4x256xf32, #tpu.memory_space<vmem>>, vector<1x256xf32>
    %38 = vector.broadcast %37 : vector<1x256xf32> to vector<16x256xf32>
    %39 = arith.mulf %36, %38 : vector<16x256xf32>
    %c3 = arith.constant 3 : index
    %c0_18 = arith.constant 0 : index
    %40 = vector.load %arg4[%c3, %c0_18] : memref<4x256xf32, #tpu.memory_space<vmem>>, vector<1x256xf32>
    %41 = vector.broadcast %40 : vector<1x256xf32> to vector<16x256xf32>
    %42 = arith.addf %39, %41 : vector<16x256xf32>
    %c0_19 = arith.constant 0 : index
    %c0_20 = arith.constant 0 : index
    %43 = vector.load %arg5[%c0_19, %c0_20] : memref<16x256xf32, #tpu.memory_space<vmem>>, vector<16x256xf32>
    tpu.vector_store %arg5[%c0_19, %c0_20], %42 {strides = array<i32>} : memref<16x256xf32, #tpu.memory_space<vmem>>, vector<16x256xf32>,
    return
  }
  func.func @transform_0(%arg0: i32) -> (i32, i32) {
    %c0_i32 = arith.constant 0 : i32
    %c0_i32_0 = arith.constant 0 : i32
    return %arg0, %c0_i32 : i32, i32
  }
  func.func @transform_1(%arg0: i32) -> (i32, i32) {
    %c0_i32 = arith.constant 0 : i32
    %c0_i32_0 = arith.constant 0 : i32
    %c0_i32_1 = arith.constant 0 : i32
    return %c0_i32, %c0_i32_0 : i32, i32
  }
  func.func @transform_2(%arg0: i32) -> (i32, i32) {
    %c0_i32 = arith.constant 0 : i32
    %c0_i32_0 = arith.constant 0 : i32
    %c0_i32_1 = arith.constant 0 : i32
    return %c0_i32, %c0_i32_0 : i32, i32
  }
  func.func @transform_3(%arg0: i32) -> (i32, i32) {
    %c0_i32 = arith.constant 0 : i32
    %c0_i32_0 = arith.constant 0 : i32
    %c0_i32_1 = arith.constant 0 : i32
    return %c0_i32, %c0_i32_0 : i32, i32
  }
  func.func @transform_4(%arg0: i32) -> (i32, i32) {
    %c0_i32 = arith.constant 0 : i32
    %c0_i32_0 = arith.constant 0 : i32
    return %arg0, %c0_i32 : i32, i32
  }
}

module attributes {stable_mosaic.version = 11 : i64} {
  func.func @_projection_head_kernel(%arg0: i32, %arg1: memref<16x48xf32, #tpu.memory_space<vmem>>, %arg2: memref<48x256xbf16, #tpu.memory_space<vmem>>, %arg3: memref<256x256xbf16, #tpu.memory_space<vmem>>, %arg4: memref<4x256xf32, #tpu.memory_space<vmem>>, %arg5: memref<16x256xf32, #tpu.memory_space<vmem>>) attributes {dimension_semantics = [#tpu.dimension_semantics<parallel>], iteration_bounds = array<i64: 1>, scalar_prefetch = 0 : i64, scratch_operands = 0 : i64, tpu.core_type = #tpu.core_type<tc>, window_params = [{transform_indices = @transform_0, window_bounds = array<i64: 16, 48>}, {pipeline_mode = #tpu.pipeline_mode<synchronous>, transform_indices = @transform_1, window_bounds = array<i64: 48, 256>}, {pipeline_mode = #tpu.pipeline_mode<synchronous>, transform_indices = @transform_2, window_bounds = array<i64: 256, 256>}, {pipeline_mode = #tpu.pipeline_mode<synchronous>, transform_indices = @transform_3, window_bounds = array<i64: 4, 256>}, {transform_indices = @transform_4, window_bounds = array<i64: 16, 256>}]} {
    %c0 = arith.constant 0 : index
    %c0_0 = arith.constant 0 : index
    %0 = vector.load %arg1[%c0, %c0_0] : memref<16x48xf32, #tpu.memory_space<vmem>>, vector<16x48xf32>
    %1 = arith.truncf %0 : vector<16x48xf32> to vector<16x48xbf16>
    %c0_1 = arith.constant 0 : index
    %c0_2 = arith.constant 0 : index
    %2 = vector.load %arg2[%c0_1, %c0_2] : memref<48x256xbf16, #tpu.memory_space<vmem>>, vector<48x256xbf16>
    %cst = arith.constant dense<0.000000e+00> : vector<16x256xf32>
    %3 = tpu.matmul %1, %2, %cst {dimension_numbers = #tpu.dot_dimension_numbers<[1], [0], [0], [1], [0, 0, 1, 1], [], []>} : vector<16x48xbf16>, vector<48x256xbf16>, vector<16x256xf32> -> vector<16x256xf32>
    %c0_3 = arith.constant 0 : index
    %c0_4 = arith.constant 0 : index
    %4 = vector.load %arg4[%c0_3, %c0_4] : memref<4x256xf32, #tpu.memory_space<vmem>>, vector<1x256xf32>
    %5 = vector.broadcast %4 : vector<1x256xf32> to vector<16x256xf32>
    %6 = arith.addf %3, %5 : vector<16x256xf32>
    %cst_5 = arith.constant 5.000000e-01 : f32
    %7 = vector.broadcast %cst_5 : f32 to vector<16x256xf32>
    %8 = arith.mulf %7, %6 : vector<16x256xf32>
    %cst_6 = arith.constant 0.707106769 : f32
    %9 = vector.broadcast %cst_6 : f32 to vector<16x256xf32>
    %10 = arith.mulf %6, %9 : vector<16x256xf32>
    %11 = math.erf %10 : vector<16x256xf32>
    %cst_7 = arith.constant 1.000000e+00 : f32
    %12 = vector.broadcast %cst_7 : f32 to vector<16x256xf32>
    %13 = arith.addf %12, %11 : vector<16x256xf32>
    %14 = arith.mulf %8, %13 : vector<16x256xf32>
    %15 = arith.truncf %14 : vector<16x256xf32> to vector<16x256xbf16>
    %c0_8 = arith.constant 0 : index
    %c0_9 = arith.constant 0 : index
    %16 = vector.load %arg3[%c0_8, %c0_9] : memref<256x256xbf16, #tpu.memory_space<vmem>>, vector<256x256xbf16>
    %cst_10 = arith.constant dense<0.000000e+00> : vector<16x256xf32>
    %17 = tpu.matmul %15, %16, %cst_10 {dimension_numbers = #tpu.dot_dimension_numbers<[1], [0], [0], [1], [0, 0, 1, 1], [], []>} : vector<16x256xbf16>, vector<256x256xbf16>, vector<16x256xf32> -> vector<16x256xf32>
    %c1 = arith.constant 1 : index
    %c0_11 = arith.constant 0 : index
    %18 = vector.load %arg4[%c1, %c0_11] : memref<4x256xf32, #tpu.memory_space<vmem>>, vector<1x256xf32>
    %19 = vector.broadcast %18 : vector<1x256xf32> to vector<16x256xf32>
    %20 = arith.addf %17, %19 : vector<16x256xf32>
    %cst_12 = arith.constant dense<0.000000e+00> : vector<16xf32>
    %21 = vector.multi_reduction <add>, %20, %cst_12 [1] : vector<16x256xf32> to vector<16xf32>
    %22 = vector.shape_cast %21 : vector<16xf32> to vector<16x1xf32>
    %cst_13 = arith.constant 2.560000e+02 : f32
    %23 = vector.broadcast %cst_13 : f32 to vector<16x1xf32>
    %24 = arith.divf %22, %23 : vector<16x1xf32>
    %25 = vector.broadcast %24 : vector<16x1xf32> to vector<16x256xf32>
    %26 = arith.subf %20, %25 : vector<16x256xf32>
    %27 = arith.mulf %26, %26 : vector<16x256xf32>
    %cst_14 = arith.constant dense<0.000000e+00> : vector<16xf32>
    %28 = vector.multi_reduction <add>, %27, %cst_14 [1] : vector<16x256xf32> to vector<16xf32>
    %29 = vector.shape_cast %28 : vector<16xf32> to vector<16x1xf32>
    %cst_15 = arith.constant 2.560000e+02 : f32
    %30 = vector.broadcast %cst_15 : f32 to vector<16x1xf32>
    %31 = arith.divf %29, %30 : vector<16x1xf32>
    %cst_16 = arith.constant 9.99999974E-6 : f32
    %32 = vector.broadcast %cst_16 : f32 to vector<16x1xf32>
    %33 = arith.addf %31, %32 : vector<16x1xf32>
    %34 = math.rsqrt %33 : vector<16x1xf32>
    %35 = vector.broadcast %34 : vector<16x1xf32> to vector<16x256xf32>
    %36 = arith.mulf %26, %35 : vector<16x256xf32>
    %c2 = arith.constant 2 : index
    %c0_17 = arith.constant 0 : index
    %37 = vector.load %arg4[%c2, %c0_17] : memref<4x256xf32, #tpu.memory_space<vmem>>, vector<1x256xf32>
    %38 = vector.broadcast %37 : vector<1x256xf32> to vector<16x256xf32>
    %39 = arith.mulf %36, %38 : vector<16x256xf32>
    %c3 = arith.constant 3 : index
    %c0_18 = arith.constant 0 : index
    %40 = vector.load %arg4[%c3, %c0_18] : memref<4x256xf32, #tpu.memory_space<vmem>>, vector<1x256xf32>
    %41 = vector.broadcast %40 : vector<1x256xf32> to vector<16x256xf32>
    %42 = arith.addf %39, %41 : vector<16x256xf32>
    %c0_19 = arith.constant 0 : index
    %c0_20 = arith.constant 0 : index
    %43 = vector.load %arg5[%c0_19, %c0_20] : memref<16x256xf32, #tpu.memory_space<vmem>>, vector<16x256xf32>
    tpu.vector_store %arg5[%c0_19, %c0_20], %42 {strides = array<i32>} : memref<16x256xf32, #tpu.memory_space<vmem>>, vector<16x256xf32>,
    return
  }
  func.func @transform_0(%arg0: i32) -> (i32, i32) {
    %c0_i32 = arith.constant 0 : i32
    %c0_i32_0 = arith.constant 0 : i32
    return %arg0, %c0_i32 : i32, i32
  }
  func.func @transform_1(%arg0: i32) -> (i32, i32) {
    %c0_i32 = arith.constant 0 : i32
    %c0_i32_0 = arith.constant 0 : i32
    %c0_i32_1 = arith.constant 0 : i32
    return %c0_i32, %c0_i32_0 : i32, i32
  }
  func.func @transform_2(%arg0: i32) -> (i32, i32) {
    %c0_i32 = arith.constant 0 : i32
    %c0_i32_0 = arith.constant 0 : i32
    %c0_i32_1 = arith.constant 0 : i32
    return %c0_i32, %c0_i32_0 : i32, i32
  }
  func.func @transform_3(%arg0: i32) -> (i32, i32) {
    %c0_i32 = arith.constant 0 : i32
    %c0_i32_0 = arith.constant 0 : i32
    %c0_i32_1 = arith.constant 0 : i32
    return %c0_i32, %c0_i32_0 : i32, i32
  }
  func.func @transform_4(%arg0: i32) -> (i32, i32) {
    %c0_i32 = arith.constant 0 : i32
    %c0_i32_0 = arith.constant 0 : i32
    return %arg0, %c0_i32 : i32, i32
  }
}

</mosaic_0001>

<bundles_post_ra>
// kernel: tpu_custom_call.1
= control target key start
LH: loop header
LB: loop body
LE: loop exit
PB: predicated region body
PF: predicated region fallthrough
CT: control target
= control target key end

     0   :  { %9 = vsyncpa [#allocation3], 0  ;;  %s1200_s0 = inlined_call_operand.hbm [shape: f32[16,48], index: 0, kind: input, shape index: {}]   ;;  %s1201_s1 = inlined_call_operand.hbm [shape: bf16[48,256], index: 1, kind: input, shape index: {}]   ;;  %s1202_s2 = inlined_call_operand.hbm [shape: bf16[256,256], index: 2, kind: input, shape index: {}]   ;;  %s1203_s3 = inlined_call_operand.hbm [shape: f32[4,256], index: 3, kind: input, shape index: {}]   ;;  %s1204_s4 = inlined_call_operand.hbm [shape: f32[16,256], index: 4, kind: output, shape index: {}]  }
   0x1   :  { %10 = vsyncpa [#allocation6], 0 }
   0x2   :  { %11 = vsyncpa [#allocation9], 0 }
   0x3   :  { %12 = vsyncpa [#allocation4], 0  ;;  %s30_s17 = sshll.u32 %s1201_s1, 4  ;;  %s1042_s18 = smov [#allocation5]   ;;  %s31_s17 = int_to_ptr.hbm [resolvable:$true] %s30_s17 }
   0x4   :  { %s32_s19 = sshll.u32 %s1042_s18, 4  ;;  %s17_s22 = sshll.u32 %s1200_s0, 4  ;;  %s33_s19 = int_to_ptr.vmem [resolvable:$true] %s32_s19  ;;  %s18_s22 = int_to_ptr.hbm [resolvable:$true] %s17_s22 }
   0x5   :  { %s1043_s23 = smov 128   ;;  %s1044_s24 = smov 8  }
   0x6   :  { %38 = dma.hbm_to_vmem [thread:$0]  %s31_s17, 768, %s33_s19, [#allocation6], %s1043_s23, %s1043_s23, %s1044_s24  }
   0x7   :  { %s1045_s25 = smov [#allocation2]   ;;  %s43_s29 = sshll.u32 %s1202_s2, 4  ;;  %s44_s29 = int_to_ptr.hbm [resolvable:$true] %s43_s29 }
   0x8   :  { %s19_s26 = sshll.u32 %s1045_s25, 4  ;;  %s57_s5 = sshll.u32 %s1203_s3, 4  ;;  %s20_s26 = int_to_ptr.vmem [resolvable:$true] %s19_s26  ;;  %s58_s5 = int_to_ptr.hbm [resolvable:$true] %s57_s5 }
   0x9   :  { %25 = dma.hbm_to_vmem [thread:$0]  %s18_s22, 256, %s20_s26, [#allocation3], %s1043_s23, %s1043_s23, %s1044_s24  }
   0xa   :  { %s1046_s6 = smov [#allocation7]   ;;  %s1047_s0 = smov [#allocation8]  }
   0xb   :  { %s45_s7 = sshll.u32 %s1046_s6, 4  ;;  %s59_s8 = sshll.u32 %s1047_s0, 4  ;;  %s46_s7 = int_to_ptr.vmem [resolvable:$true] %s45_s7  ;;  %s60_s8 = int_to_ptr.vmem [resolvable:$true] %s59_s8 }
   0xc   :  { %51 = dma.hbm_to_vmem [thread:$0]  %s44_s29, 4096, %s46_s7, [#allocation6], %s1043_s23, %s1043_s23, %s1044_s24  }
   0xd   :  { %62 = dma.hbm_to_vmem [thread:$0]  %s58_s5, 128, %s60_s8, [#allocation9]  }
   0xe   :  { %1034 = dma.done.wait [#allocation3], 256  }
   0xf   :  { %1035 = vsyncadd [#allocation3], 4294967040 }
  0x10   :  { %1036 = dma.done.wait [#allocation6], 4864  }
  0x11   :  { %1037 = vsyncadd [#allocation6], 4294962432 }
  0x12   :  { %1038 = dma.done.wait [#allocation9], 128  }
  0x13   :  { %1039 = vsyncadd [#allocation9], 4294967168  ;;  %v712_v0 = vld [vmem:[#allocation5 + $0x20] sm:$0xf]  ;;  %v857_v1 = vld [vmem:[#allocation5 + $0x24] sm:$0xf0] }
  0x14   :  { %v856_v2 = vld [vmem:[#allocation5 + $0x24] sm:$0xf]  ;;  %v713_v3 = vor.u32 %v857_v1, %v712_v0  ;;  %v714_v4 = vld [vmem:[#allocation5 + $0x28] sm:$0xf0]  ;;  %v704_v5 = vld [vmem:[#allocation5 + $0x10] sm:$0xf] }
  0x15   :  { %v855_v6 = vld [vmem:[#allocation5 + $0x14] sm:$0xf0]  ;;  %v717_v7 = vor.u32 %v856_v2, %v714_v4  ;;  %v854_v8 = vld [vmem:[#allocation5 + $0x14] sm:$0xf]  ;;  %v706_v9 = vld [vmem:[#allocation5 + $0x18] sm:$0xf0] }
  0x16   :  { %134 = vmatpush.bf16.msra.mxu0 %v713_v3  ;;  %v705_v10 = vor.u32 %v855_v6, %v704_v5  ;;  %v709_v11 = vor.u32 %v854_v8, %v706_v9  ;;  %v696_v12 = vld [vmem:[#allocation5] sm:$0xf]  ;;  %v853_v13 = vld [vmem:[#allocation5 + $0x4] sm:$0xf0]  ;;  %v852_v14 = vld [vmem:[#allocation5 + $0x4] sm:$0xf] }
  0x17   :  { %148 = vmatpush.bf16.msra.mxu1 %v717_v7  ;;  %v698_v15 = vld [vmem:[#allocation5 + $0x8] sm:$0xf0]  ;;  %v697_v16 = vor.u32 %v853_v13, %v696_v12  ;;  %v80_v17 = vld [vmem:[#allocation2] sm:$0xff]  ;;  %v81_v18 = vld [vmem:[#allocation2 + $0x8] sm:$0xff]  ;;  %vm125_vm0 = vcmask 392192   ;;  %s1049_s2 = smov [#allocation10]  }
  0x18   :  { %v701_v19 = vor.u32 %v852_v14, %v698_v15  ;;  %v82_v20 = vpack.c.bf16 %v81_v18, %v80_v17  ;;  %v89_v21 = vld [vmem:[#allocation8] ss:$4 sm:$0x3]  ;;  %v782_v24 = vld [vmem:[#allocation7 + $0x70] sm:$0xf]  ;;  %s677_s3 = sshll.u32 %s1049_s2, 4  ;;  %s678_s3 = int_to_ptr.vmem [resolvable:$true] %s677_s3 }
  0x19   :  { %v91_v22 = vperm.slane %v89_v21, 0  ;;  %v92_v23 = vperm.slane %v89_v21, 1  ;;  %v873_v25 = vld [vmem:[#allocation7 + $0x74] sm:$0xf0]  ;;  %v846_v26 = vld [vmem:[#allocation7 + $0xf0] sm:$0xf] }
  0x1a   :  { %135 = vmatpush.bf16.msra.mxu0 %v705_v10  ;;  %v783_v28 = vor.u32 %v873_v25, %v782_v24  ;;  %v889_v29 = vld [vmem:[#allocation7 + $0xf4] sm:$0xf0]  ;;  %v872_v30 = vld [vmem:[#allocation7 + $0x74] sm:$0xf]  ;;  %v784_v31 = vld [vmem:[#allocation7 + $0x78] sm:$0xf0] }
  0x1b   :  { %149 = vmatpush.bf16.msra.mxu1 %v709_v11  ;;  %v847_v34 = vor.u32 %v889_v29, %v846_v26  ;;  %v787_v35 = vor.u32 %v872_v30, %v784_v31  ;;  %v888_v36 = vld [vmem:[#allocation7 + $0xf4] sm:$0xf]  ;;  %v848_v37 = vld [vmem:[#allocation7 + $0xf8] sm:$0xf0]  ;;  %v774_v40 = vld [vmem:[#allocation7 + $0x60] sm:$0xf] }
  0x1c   :  { %534 = vmatpush.bf16.msra.mxu2 %v783_v28  ;;  %v851_v38 = vor.u32 %v888_v36, %v848_v37  ;;  %v871_v42 = vld [vmem:[#allocation7 + $0x64] sm:$0xf0]  ;;  %v838_v44 = vld [vmem:[#allocation7 + $0xe0] sm:$0xf]  ;;  %v870_v46 = vld [vmem:[#allocation7 + $0x64] sm:$0xf] }
  0x1d   :  { %548 = vmatpush.bf16.msra.mxu3 %v847_v34  ;;  %v775_v43 = vor.u32 %v871_v42, %v774_v40  ;;  %v887_v45 = vld [vmem:[#allocation7 + $0xe4] sm:$0xf0]  ;;  %v776_v48 = vld [vmem:[#allocation7 + $0x68] sm:$0xf0]  ;;  %v886_v49 = vld [vmem:[#allocation7 + $0xe4] sm:$0xf] }
  0x1e   :  { %136 = vmatpush.bf16.msra.mxu0 %v697_v16  ;;  %v839_v47 = vor.u32 %v887_v45, %v838_v44  ;;  %v840_v50 = vld [vmem:[#allocation7 + $0xe8] sm:$0xf0]  ;;  %v779_v52 = vor.u32 %v870_v46, %v776_v48  ;;  %v766_v54 = vld [vmem:[#allocation7 + $0x50] sm:$0xf]  ;;  %v869_v55 = vld [vmem:[#allocation7 + $0x54] sm:$0xf0] }
  0x1f   :  { %150 = vmatpush.bf16.msra.mxu1 %v701_v19  ;;  %v843_v53 = vor.u32 %v886_v49, %v840_v50  ;;  %v767_v57 = vor.u32 %v869_v55, %v766_v54  ;;  %v830_v58 = vld [vmem:[#allocation7 + $0xd0] sm:$0xf]  ;;  %v885_v59 = vld [vmem:[#allocation7 + $0xd4] sm:$0xf0]  ;;  %v868_v63 = vld [vmem:[#allocation7 + $0x54] sm:$0xf] }
  0x20   :  { %535 = vmatpush.bf16.msra.mxu2 %v775_v43  ;;  %v831_v62 = vor.u32 %v885_v59, %v830_v58  ;;  %v768_v0 = vld [vmem:[#allocation7 + $0x58] sm:$0xf0]  ;;  %v884_v3 = vld [vmem:[#allocation7 + $0xd4] sm:$0xf]  ;;  %v758_v11 = vld [vmem:[#allocation7 + $0x40] sm:$0xf] }
  0x21   :  { %718 = vmatmul.msk.bf16.vlgmr.msra.gmra.mxu0 %vm125_vm0, %v82_v20  ;;  %549 = vmatpush.bf16.msra.mxu3 %v839_v47  ;;  %v771_v2 = vor.u32 %v868_v63, %v768_v0  ;;  %v832_v4 = vld [vmem:[#allocation7 + $0xd8] sm:$0xf0]  ;;  %v867_v12 = vld [vmem:[#allocation7 + $0x44] sm:$0xf0]  ;;  %v822_v13 = vld [vmem:[#allocation7 + $0xc0] sm:$0xf] }
  0x22   :  { %719 = vmatmul.msk.bf16.vlgmr.msra.gmra.mxu1 %vm125_vm0, %v82_v20  ;;  %562 = vmatpush.bf16.msrb.mxu0 %v787_v35  ;;  %v835_v8 = vor.u32 %v884_v3, %v832_v4  ;;  %v759_v14 = vor.u32 %v867_v12, %v758_v11  ;;  %v883_v15 = vld [vmem:[#allocation7 + $0xc4] sm:$0xf0]  ;;  %v866_v16 = vld [vmem:[#allocation7 + $0x44] sm:$0xf]  ;;  %v760_v17 = vld [vmem:[#allocation7 + $0x48] sm:$0xf0] }
  0x23   :  { %576 = vmatpush.bf16.msrb.mxu1 %v851_v38  ;;  %v823_v20 = vor.u32 %v883_v15, %v822_v13  ;;  %v763_v21 = vor.u32 %v866_v16, %v760_v17  ;;  %v824_v25 = vld [vmem:[#allocation7 + $0xc8] sm:$0xf0]  ;;  %v865_v28 = vld [vmem:[#allocation7 + $0x34] sm:$0xf0]  ;;  %v814_v30 = vld [vmem:[#allocation7 + $0xb0] sm:$0xf] }
  0x24   :  { %536 = vmatpush.bf16.msra.mxu2 %v767_v57  ;;  %v881_v31 = vld [vmem:[#allocation7 + $0xb4] sm:$0xf0]  ;;  %v864_v36 = vld [vmem:[#allocation7 + $0x34] sm:$0xf]  ;;  %v752_v40 = vld [vmem:[#allocation7 + $0x38] sm:$0xf0] }
  0x25   :  { %550 = vmatpush.bf16.msra.mxu3 %v831_v62  ;;  %v815_v35 = vor.u32 %v881_v31, %v814_v30  ;;  %v755_v42 = vor.u32 %v864_v36, %v752_v40  ;;  %v880_v43 = vld [vmem:[#allocation7 + $0xb4] sm:$0xf]  ;;  %v816_v44 = vld [vmem:[#allocation7 + $0xb8] sm:$0xf0]  ;;  %v742_v45 = vld [vmem:[#allocation7 + $0x20] sm:$0xf] }
  0x26   :  { %563 = vmatpush.bf16.msrb.mxu0 %v779_v52  ;;  %v819_v46 = vor.u32 %v880_v43, %v816_v44  ;;  %v863_v47 = vld [vmem:[#allocation7 + $0x24] sm:$0xf0]  ;;  %v806_v48 = vld [vmem:[#allocation7 + $0xa0] sm:$0xf]  ;;  %v862_v55 = vld [vmem:[#allocation7 + $0x24] sm:$0xf] }
  0x27   :  { %577 = vmatpush.bf16.msrb.mxu1 %v843_v53  ;;  %v879_v49 = vld [vmem:[#allocation7 + $0xa4] sm:$0xf0]  ;;  %v743_v53 = vor.u32 %v863_v47, %v742_v45  ;;  %v744_v58 = vld [vmem:[#allocation7 + $0x28] sm:$0xf0]  ;;  %v734_v63 = vld [vmem:[#allocation7 + $0x10] sm:$0xf] }
  0x28   :  { %537 = vmatpush.bf16.msra.mxu2 %v759_v14  ;;  %v807_v54 = vor.u32 %v879_v49, %v806_v48  ;;  %v747_v59 = vor.u32 %v862_v55, %v744_v58  ;;  %v808_v62 = vld [vmem:[#allocation7 + $0xa8] sm:$0xf0]  ;;  %v798_v3 = vld [vmem:[#allocation7 + $0x90] sm:$0xf]  ;;  %v877_v4 = vld [vmem:[#allocation7 + $0x94] sm:$0xf0] }
  0x29   :  { %551 = vmatpush.bf16.msra.mxu3 %v823_v20  ;;  %v736_v13 = vld [vmem:[#allocation7 + $0x18] sm:$0xf0]  ;;  %v876_v16 = vld [vmem:[#allocation7 + $0x94] sm:$0xf]  ;;  %v726_v20 = vld [vmem:[#allocation7] sm:$0xf] }
  0x2a   :  { %564 = vmatpush.bf16.msrb.mxu0 %v771_v2  ;;  %v861_v2 = vld [vmem:[#allocation7 + $0x14] sm:$0xf0]  ;;  %v800_v17 = vld [vmem:[#allocation7 + $0x98] sm:$0xf0]  ;;  %v728_v30 = vld [vmem:[#allocation7 + $0x8] sm:$0xf0] }
  0x2b   :  { %578 = vmatpush.bf16.msrb.mxu1 %v835_v8  ;;  %v799_v8 = vor.u32 %v877_v4, %v798_v3  ;;  %v792_v36 = vld [vmem:[#allocation7 + $0x88] sm:$0xf0]  ;;  %s679_s11 = sshll.u32 %s1204_s4, 4  ;;  %s1050_s12 = smov 256   ;;  %s680_s11 = int_to_ptr.hbm [resolvable:$true] %s679_s11 }
  0x2c   :  { %s1051_s13 = smov 16  }
  0x2d   :  { %552 = vmatpush.bf16.msra.mxu3 %v815_v35  ;;  %v874_v35 = vld [vmem:[#allocation7 + $0x84] sm:$0xf] }
  0x2e   :  { %565 = vmatpush.bf16.msrb.mxu0 %v763_v21  ;;  %v803_v21 = vor.u32 %v876_v16, %v800_v17  ;;  %v795_v40 = vor.u32 %v874_v35, %v792_v36 }
  0x31   :  { %553 = vmatpush.bf16.msra.mxu3 %v807_v54 }
  0x32   :  { %566 = vmatpush.bf16.msrb.mxu0 %v755_v42 }
  0x35   :  { %554 = vmatpush.bf16.msra.mxu3 %v799_v8 }
  0x36   :  { %567 = vmatpush.bf16.msrb.mxu0 %v747_v59 }
  0x9e   :  { %v138_v27 = vpop.f32.mrf.mxu0 }
  0x9f   :  { %v1089_v32 = vadd.f32 %v138_v27, %v91_v22  ;;  %v152_v33 = vpop.f32.mrf.mxu1  ;;  %v750_v27 = vld [vmem:[#allocation7 + $0x30] sm:$0xf] }
  0xa0   :  { %v1091_v39 = vadd.f32 %v152_v33, %v92_v23  ;;  %v751_v29 = vor.u32 %v865_v28, %v750_v27 }
  0xa1   :  { %v1094_v41 = vmul.f32 0.70710677, %v1089_v32 }
  0xa2   :  { %v1097_v51 = vmul.f32 0.70710677, %v1091_v39  ;;  %538 = vmatpush.bf16.msra.mxu2 %v751_v29  ;;  %v858_v29 = vld [vmem:[#allocation7 + $0x4] sm:$0xf] }
  0xa3   :  { %v165_v5 = vmul.f32 %v1094_v41, %v1094_v41 }
  0xa4   :  { %v205_v6 = vmul.f32 %v1097_v51, %v1097_v51 }
  0xa5   :  { %v1115_v18 = vmin.f32 %v165_v5, 16.0 }
  0xa6   :  { %v140_v56 = vpop.f32.mrf.mxu0  ;;  %v1117_v19 = vmin.f32 %v205_v6, 16.0  ;;  %539 = vmatpush.bf16.msra.mxu2 %v743_v53  ;;  %v735_v6 = vor.u32 %v861_v2, %v734_v63 }
  0xa7   :  { %v1099_v60 = vadd.f32 %v140_v56, %v91_v22  ;;  %v154_v61 = vpop.f32.mrf.mxu1  ;;  %v882_v22 = vld [vmem:[#allocation7 + $0xc4] sm:$0xf]  ;;  %v167_v33 = vmul.f32 2.1237322e-06, %v1115_v18  ;;  %v178_v42 = vmul.f32 3.8918573e-05, %v1115_v18 }
  0xa8   :  { %v1101_v1 = vadd.f32 %v154_v61, %v92_v23  ;;  %v827_v26 = vor.u32 %v882_v22, %v824_v25  ;;  %v207_v34 = vmul.f32 2.1237322e-06, %v1117_v19  ;;  %v878_v61 = vld [vmem:[#allocation7 + $0xa4] sm:$0xf]  ;;  %v859_v22 = vld [vmem:[#allocation7 + $0x4] sm:$0xf0] }
  0xa9   :  { %v1108_v7 = vmul.f32 0.70710677, %v1099_v60  ;;  %v168_v50 = vadd.f32 0.00028619796, %v167_v33  ;;  %v811_v0 = vor.u32 %v878_v61, %v808_v62  ;;  %v875_v25 = vld [vmem:[#allocation7 + $0x84] sm:$0xf0]  ;;  %v727_v27 = vor.u32 %v859_v22, %v726_v20 }
  0xaa   :  { %v1111_v9 = vmul.f32 0.70710677, %v1101_v1  ;;  %579 = vmatpush.bf16.msrb.mxu1 %v827_v26  ;;  %v208_v52 = vadd.f32 0.00028619796, %v207_v34  ;;  %540 = vmatpush.bf16.msra.mxu2 %v735_v6  ;;  %v731_v34 = vor.u32 %v858_v29, %v728_v30  ;;  %v218_v44 = vmul.f32 3.8918573e-05, %v1117_v19 }
  0xab   :  { %v245_v10 = vmul.f32 %v1108_v7, %v1108_v7  ;;  %v169_v5 = vmul.f32 %v168_v50, %v1115_v18  ;;  %v179_v47 = vadd.f32 0.001143296, %v178_v42 }
  0xac   :  { %v285_v24 = vmul.f32 %v1111_v9, %v1111_v9  ;;  %v209_v11 = vmul.f32 %v208_v52, %v1117_v19  ;;  %v219_v52 = vadd.f32 0.001143296, %v218_v44 }
  0xad   :  { %v1119_v23 = vmin.f32 %v245_v10, 16.0  ;;  %v860_v10 = vld [vmem:[#allocation7 + $0x14] sm:$0xf]  ;;  %v170_v26 = vadd.f32 0.0036580483, %v169_v5  ;;  %v180_v55 = vmul.f32 %v179_v47, %v1115_v18 }
  0xae   :  { %v1126_v38 = vmin.f32 %v285_v24, 16.0  ;;  %580 = vmatpush.bf16.msrb.mxu1 %v819_v46  ;;  %v739_v15 = vor.u32 %v860_v10, %v736_v13  ;;  %v790_v24 = vld [vmem:[#allocation7 + $0x80] sm:$0xf]  ;;  %v210_v31 = vadd.f32 0.0036580483, %v209_v11  ;;  %541 = vmatpush.bf16.msra.mxu2 %v727_v27 }
  0xaf   :  { %v247_v37 = vmul.f32 2.1237322e-06, %v1119_v23  ;;  %v791_v28 = vor.u32 %v875_v25, %v790_v24  ;;  %v258_v43 = vmul.f32 3.8918573e-05, %v1119_v23  ;;  %v171_v46 = vmul.f32 %v170_v26, %v1115_v18 }
  0xb0   :  { %v287_v57 = vmul.f32 2.1237322e-06, %v1126_v38  ;;  %568 = vmatpush.bf16.msrb.mxu0 %v739_v15  ;;  %v298_v45 = vmul.f32 3.8918573e-05, %v1126_v38  ;;  %v211_v49 = vmul.f32 %v210_v31, %v1117_v19  ;;  %v181_v61 = vadd.f32 0.014752088, %v180_v55 }
  0xb1   :  { %v248_v56 = vadd.f32 0.00028619796, %v247_v37  ;;  %555 = vmatpush.bf16.msra.mxu3 %v791_v28  ;;  %v259_v48 = vadd.f32 0.001143296, %v258_v43  ;;  %v172_v59 = vadd.f32 0.05243302, %v171_v46 }
  0xb2   :  { %v288_v12 = vadd.f32 0.00028619796, %v287_v57  ;;  %581 = vmatpush.bf16.msrb.mxu1 %v811_v0  ;;  %v299_v53 = vadd.f32 0.001143296, %v298_v45  ;;  %v220_v57 = vmul.f32 %v219_v52, %v1117_v19  ;;  %v212_v63 = vadd.f32 0.05243302, %v211_v49 }
  0xb3   :  { %v249_v14 = vmul.f32 %v248_v56, %v1119_v23  ;;  %v260_v56 = vmul.f32 %v259_v48, %v1119_v23  ;;  %v182_v5 = vmul.f32 %v181_v61, %v1115_v18  ;;  %v173_v11 = vmul.f32 %v172_v59, %v1115_v18 }
  0xb4   :  { %v289_v33 = vmul.f32 %v288_v12, %v1126_v38  ;;  %569 = vmatpush.bf16.msrb.mxu0 %v731_v34  ;;  %v300_v58 = vmul.f32 %v299_v53, %v1126_v38  ;;  %v221_v2 = vadd.f32 0.014752088, %v220_v57 }
  0xb5   :  { %v250_v37 = vadd.f32 0.0036580483, %v249_v14  ;;  %v261_v62 = vadd.f32 0.014752088, %v260_v56  ;;  %v183_v12 = vadd.f32 0.112945676, %v182_v5  ;;  %v213_v14 = vmul.f32 %v212_v63, %v1117_v19 }
  0xb6   :  { %582 = vmatpush.bf16.msrb.mxu1 %v803_v21  ;;  %v290_v50 = vadd.f32 0.0036580483, %v289_v33  ;;  %v301_v3 = vadd.f32 0.014752088, %v300_v58  ;;  %v222_v8 = vmul.f32 %v221_v2, %v1117_v19  ;;  %v174_v26 = vadd.f32 0.18741608, %v173_v11 }
  0xb7   :  { %v251_v54 = vmul.f32 %v250_v37, %v1119_v23  ;;  %v262_v6 = vmul.f32 %v261_v62, %v1119_v23  ;;  %v184_v21 = vmul.f32 %v183_v12, %v1115_v18  ;;  %v214_v29 = vadd.f32 0.18741608, %v213_v14 }
  0xb8   :  { %v291_v0 = vmul.f32 %v290_v50, %v1126_v38  ;;  %v302_v10 = vmul.f32 %v301_v3, %v1126_v38  ;;  %v223_v16 = vadd.f32 0.112945676, %v222_v8  ;;  %v175_v44 = vmul.f32 %v174_v26, %v1115_v18 }
  0xb9   :  { %v252_v4 = vadd.f32 0.05243302, %v251_v54  ;;  %v263_v13 = vadd.f32 0.112945676, %v262_v6  ;;  %v185_v27 = vadd.f32 0.4994258, %v184_v21  ;;  %v215_v45 = vmul.f32 %v214_v29, %v1117_v19 }
  0xba   :  { %583 = vmatpush.bf16.msrb.mxu1 %v795_v40  ;;  %v292_v15 = vadd.f32 0.05243302, %v291_v0  ;;  %v303_v17 = vadd.f32 0.112945676, %v302_v10  ;;  %v224_v24 = vmul.f32 %v223_v16, %v1117_v19  ;;  %v176_v50 = vadd.f32 1.1283791, %v175_v44 }
  0xbb   :  { %v253_v20 = vmul.f32 %v252_v4, %v1119_v23  ;;  %v264_v22 = vmul.f32 %v263_v13, %v1119_v23  ;;  %v186_v35 = vmul.f32 %v185_v27, %v1115_v18  ;;  %v216_v52 = vadd.f32 1.1283791, %v215_v45 }
  0xbc   :  { %v304_v25 = vmul.f32 %v303_v17, %v1126_v38  ;;  %v293_v30 = vmul.f32 %v292_v15, %v1126_v38  ;;  %v225_v31 = vadd.f32 0.4994258, %v224_v24 }
  0xbd   :  { %v265_v28 = vadd.f32 0.4994258, %v264_v22  ;;  %v254_v34 = vadd.f32 0.18741608, %v253_v20  ;;  %v187_v42 = vadd.f32 1.0, %v186_v35  ;;  %v217_v59 = vmul.f32 %v216_v52, %v1097_v51 }
  0xbe   :  { %v305_v33 = vadd.f32 0.4994258, %v304_v25  ;;  %v226_v37 = vmul.f32 %v225_v31, %v1117_v19  ;;  %v294_v46 = vadd.f32 0.18741608, %v293_v30  ;;  %v157_v52 = vmul.f32 0.5, %v1089_v32 }
  0xbf   :  { %v266_v36 = vmul.f32 %v265_v28, %v1119_v23  ;;  %v255_v48 = vmul.f32 %v254_v34, %v1119_v23  ;;  %900 = vrcp.f32 %v187_v42  ;;  %v197_v55 = vand.u32 2147483647, %v187_v42  ;;  %v368_v32 = vld [vmem:[#allocation8 + $0x1] ss:$4 sm:$0x3] }
  0xc0   :  { %v306_v40 = vmul.f32 %v305_v33, %v1126_v38  ;;  %v227_v47 = vadd.f32 1.0, %v226_v37  ;;  %v295_v53 = vmul.f32 %v294_v46, %v1126_v38  ;;  %v199_v18 = vand.u32 2147483648, %v187_v42 }
  0xc1   :  { %v267_v43 = vadd.f32 1.0, %v266_v36  ;;  %v256_v54 = vadd.f32 1.1283791, %v255_v48  ;;  %v177_v23 = vmul.f32 %v176_v50, %v1094_v41  ;;  %vm193_vm1 = vweird.f32 %v187_v42 }
  0xc2   :  { %v1164_v49 = vadd.f32 1.0, %v306_v40  ;;  %v296_v61 = vadd.f32 1.1283791, %v295_v53  ;;  %vm1171_vm3 = vcmp.eq.f32.partialorder %v197_v55, 8.507059e+37  ;;  %v200_v4 = vor.u32 1.1754944e-38, %v199_v18 }
  0xc3   :  { %902 = vrcp.f32 %v267_v43  ;;  %v277_v19 = vand.u32 2147483647, %v267_v43  ;;  %v279_v57 = vand.u32 2147483648, %v267_v43  ;;  %v257_v0 = vmul.f32 %v256_v54, %v1108_v7 }
  0xc4   :  { %904 = vrcp.f32 %v227_v47  ;;  %vm273_vm2 = vweird.f32 %v267_v43  ;;  %vm233_vm5 = vweird.f32 %v227_v47  ;;  %v237_v13 = vand.u32 2147483647, %v227_v47 }
  0xc5   :  { %906 = vrcp.f32 %v1164_v49  ;;  %v901_v56 = vpop.eup %900  ;;  %vm1175_vm4 = vcmp.eq.f32.partialorder %v277_v19, 8.507059e+37  ;;  %v280_v51 = vor.u32 1.1754944e-38, %v279_v57  ;;  %v239_v14 = vand.u32 2147483648, %v227_v47 }
  0xc6   :  { %v189_v62 = vmul.f32 %v901_v56, %v187_v42  ;;  %vm194_vm6 = vweird.f32 %v901_v56  ;;  %vm313_vm10 = vweird.f32 %v1164_v49  ;;  %v317_v21 = vand.u32 2147483647, %v1164_v49 }
  0xc7   :  { %vm195_vm9 = vmor %vm193_vm1, %vm194_vm6  ;;  %v319_v22 = vand.u32 2147483648, %v1164_v49  ;;  %vm238_vm14 = vcmp.eq.f32.partialorder %v237_v13, 8.507059e+37  ;;  %v240_v29 = vor.u32 1.1754944e-38, %v239_v14  ;;  %v297_v35 = vmul.f32 %v296_v61, %v1111_v9 }
  0xc8   :  { %v190_v2 = vsub.f32 1.0, %v189_v62  ;;  %vm318_vm0 = vcmp.eq.f32.partialorder %v317_v21, 8.507059e+37  ;;  %v159_v53 = vmul.f32 0.5, %v1099_v60  ;;  %v160_v19 = vmul.f32 0.5, %v1101_v1 }
  0xc9   :  { %v903_v58 = vpop.eup %902  ;;  %v320_v40 = vor.u32 1.1754944e-38, %v319_v22  ;;  %v371_v62 = vperm.slane %v368_v32, 1  ;;  %v1048_v14 = vmov 256.0  }
  0xca   :  { %v905_v63 = vpop.eup %904  ;;  %v269_v38 = vmul.f32 %v903_v58, %v267_v43  ;;  %v191_v10 = vmul.f32 %v901_v56, %v190_v2  ;;  %vm274_vm7 = vweird.f32 %v903_v58  ;;  %908 = vrcp.f32 %v1048_v14 }
  0xcb   :  { %v229_v5 = vmul.f32 %v905_v63, %v227_v47  ;;  %v907_v6 = vpop.eup %906  ;;  %vm234_vm8 = vweird.f32 %v905_v63  ;;  %vm275_vm11 = vmor %vm273_vm2, %vm274_vm7 }
  0xcc   :  { %v270_v8 = vsub.f32 1.0, %v269_v38  ;;  %v309_v11 = vmul.f32 %v907_v6, %v1164_v49  ;;  %v192_v15 = vadd.f32 %v901_v56, %v191_v10  ;;  %vm314_vm12 = vweird.f32 %v907_v6  ;;  %vm235_vm13 = vmor %vm233_vm5, %vm234_vm8 }
  0xcd   :  { %v230_v7 = vsub.f32 1.0, %v229_v5  ;;  %vm315_vm15 = vmor %vm313_vm10, %vm314_vm12 }
  0xce   :  { %v271_v12 = vmul.f32 %v903_v58, %v270_v8  ;;  %v310_v17 = vsub.f32 1.0, %v309_v11  ;;  %v196_v24 = vsel %vm195_vm9, %v901_v56, %v192_v15  ;;  %v158_v56 = vmul.f32 0.5, %v1091_v39 }
  0xcf   :  { %v231_v16 = vmul.f32 %v905_v63, %v230_v7  ;;  %v201_v27 = vsel %vm1171_vm3, %v200_v4, %v196_v24 }
  0xd0   :  { %v272_v20 = vadd.f32 %v903_v58, %v271_v12  ;;  %v311_v26 = vmul.f32 %v907_v6, %v310_v17  ;;  %v202_v30 = vmul.f32 %v201_v27, %v177_v23  ;;  %v909_v15 = vpop.eup %908 }
  0xd1   :  { %v232_v25 = vadd.f32 %v905_v63, %v231_v16  ;;  %v597_v16 = vmul.f32 256.0, %v909_v15  ;;  %vm601_vm1 = vweird.f32 %v909_v15 }
  0xd2   :  { %v276_v28 = vsel %vm275_vm11, %v903_v58, %v272_v20  ;;  %v312_v34 = vadd.f32 %v907_v6, %v311_v26  ;;  %v720_v42 = vclamps-f32 %v202_v30, 1.0 }
  0xd3   :  { %v281_v31 = vsel %vm1175_vm4, %v280_v51, %v276_v28  ;;  %v236_v33 = vsel %vm235_vm13, %v905_v63, %v232_v25  ;;  %v370_v63 = vperm.slane %v368_v32, 0  ;;  %v598_v17 = vsub.f32 1.0, %v597_v16 }
  0xd4   :  { %v282_v36 = vmul.f32 %v281_v31, %v257_v0  ;;  %v241_v37 = vsel %vm238_vm14, %v240_v29, %v236_v33  ;;  %v316_v44 = vsel %vm315_vm15, %v907_v6, %v312_v34  ;;  %v325_v47 = vadd.f32 1.0, %v720_v42 }
  0xd5   :  { %v242_v43 = vmul.f32 %v241_v37, %v217_v59  ;;  %v321_v46 = vsel %vm318_vm0, %v320_v40, %v316_v44  ;;  %v599_v20 = vmul.f32 %v909_v15, %v598_v17 }
  0xd6   :  { %v722_v45 = vclamps-f32 %v282_v36, 1.0  ;;  %v322_v50 = vmul.f32 %v321_v46, %v297_v35  ;;  %v329_v18 = vmul.f32 %v325_v47, %v157_v52 }
  0xd7   :  { %v721_v48 = vclamps-f32 %v242_v43, 1.0  ;;  %v600_v21 = vadd.f32 %v909_v15, %v599_v20 }
  0xd8   :  { %v327_v9 = vadd.f32 1.0, %v722_v45  ;;  %v723_v54 = vclamps-f32 %v322_v50, 1.0 }
  0xd9   :  { %v326_v55 = vadd.f32 1.0, %v721_v48  ;;  %v602_v22 = vsel %vm601_vm1, %v909_v15, %v600_v21 }
  0xda   :  { %v331_v49 = vmul.f32 %v327_v9, %v159_v53  ;;  %v328_v57 = vadd.f32 1.0, %v723_v54  ;;  %v648_v9 = vld [vmem:[#allocation8 + $0x2] ss:$4 sm:$0x3] }
  0xdb   :  { %v330_v23 = vmul.f32 %v326_v55, %v158_v56 }
  0xdc   :  { %v333_v58 = vpack.c.bf16 %v331_v49, %v329_v18  ;;  %v332_v59 = vmul.f32 %v328_v57, %v160_v19  ;;  %v659_v18 = vld [vmem:[#allocation8 + $0x3] ss:$4 sm:$0x3]  ;;  %v650_v19 = vperm.slane %v648_v9, 0  ;;  %v651_v57 = vperm.slane %v648_v9, 1 }
  0xde   :  { %542 = vmatmul.bf16.vlgmr.msra.gmra.mxu2 %v333_v58  ;;  %570 = vmatmul.bf16.vlgmr.msrb.gmra.mxu0 %v333_v58  ;;  %v334_v61 = vpack.c.bf16 %v332_v59, %v330_v23  ;;  %v661_v59 = vperm.slane %v659_v18, 0 }
  0xe0   :  { %556 = vmatmul.bf16.vlgmr.msra.gmra.mxu3 %v334_v61  ;;  %584 = vmatmul.bf16.vlgmr.msrb.gmra.mxu1 %v334_v61  ;;  %v662_v61 = vperm.slane %v659_v18, 1 }
 0x15b   :  { %v571_v60 = vpop.f32.mrf.mxu0 }
 0x15c   :  { %v572_v0 = vadd.f32 %v571_v60, %v371_v62 }
 0x15d   :  { %v585_v2 = vpop.f32.mrf.mxu1 }
 0x15e   :  { %v586_v4 = vadd.f32 %v585_v2, %v572_v0 }
 0x161   :  { %v543_v38 = vpop.f32.mrf.mxu2 }
 0x162   :  { %v544_v3 = vadd.f32 %v543_v38, %v370_v63 }
 0x163   :  { %v557_v39 = vpop.f32.mrf.mxu3  ;;  %v573_v5 = vpop.f32.mrf.mxu0 }
 0x164   :  { %v558_v1 = vadd.f32 %v557_v39, %v544_v3  ;;  %v574_v8 = vadd.f32 %v573_v5, %v371_v62 }
 0x165   :  { %v587_v10 = vpop.f32.mrf.mxu1 }
 0x166   :  { %v590_v6 = vadd.f32 %v586_v4, %v558_v1  ;;  %v588_v11 = vadd.f32 %v587_v10, %v574_v8 }
 0x168   :  { %591 = vadd.xlane.f32.xlu0 %v590_v6 }
 0x169   :  { %v545_v41 = vpop.f32.mrf.mxu2 }
 0x16a   :  { %v546_v51 = vadd.f32 %v545_v41, %v370_v63 }
 0x16b   :  { %v559_v7 = vpop.f32.mrf.mxu3 }
 0x16c   :  { %v560_v12 = vadd.f32 %v559_v7, %v546_v51 }
 0x16e   :  { %v593_v13 = vadd.f32 %v588_v11, %v560_v12 }
 0x170   :  { %594 = vadd.xlane.f32.xlu0 %v593_v13 }
 0x1db   :  { %v592_v24 = vpop.xlane.xlu0 %591 }
 0x1dc   :  { %v603_v25 = vmul.f32 %v602_v22, %v592_v24 }
 0x1de   :  { %v605_v26 = vsub.f32 %v558_v1, %v603_v25  ;;  %v606_v27 = vsub.f32 %v586_v4, %v603_v25 }
 0x1e0   :  { %v609_v28 = vmul.f32 %v605_v26, %v605_v26  ;;  %v610_v29 = vmul.f32 %v606_v27, %v606_v27 }
 0x1e2   :  { %v613_v30 = vadd.f32 %v610_v29, %v609_v28 }
 0x1e3   :  { %v595_v31 = vpop.xlane.xlu0 %594 }
 0x1e4   :  { %v604_v33 = vmul.f32 %v602_v22, %v595_v31  ;;  %614 = vadd.xlane.f32.xlu1 %v613_v30 }
 0x1e6   :  { %v607_v34 = vsub.f32 %v560_v12, %v604_v33  ;;  %v608_v35 = vsub.f32 %v588_v11, %v604_v33 }
 0x1e8   :  { %v611_v36 = vmul.f32 %v607_v34, %v607_v34  ;;  %v612_v37 = vmul.f32 %v608_v35, %v608_v35 }
 0x1ea   :  { %v616_v40 = vadd.f32 %v612_v37, %v611_v36 }
 0x1ec   :  { %617 = vadd.xlane.f32.xlu1 %v616_v40 }
 0x257   :  { %v615_v42 = vpop.xlane.xlu1 %614 }
 0x258   :  { %v619_v43 = vmul.f32 %v615_v42, %v602_v22 }
 0x25a   :  { %v621_v44 = vadd.f32 1e-05, %v619_v43 }
 0x25c   :  { %910 = vrsqrt.f32 %v621_v44  ;;  %vm629_vm3 = vweird.f32 %v621_v44 }
 0x25f   :  { %v618_v45 = vpop.xlane.xlu1 %617 }
 0x260   :  { %v620_v46 = vmul.f32 %v618_v45, %v602_v22 }
 0x262   :  { %v911_v47 = vpop.eup %910  ;;  %v622_v48 = vadd.f32 1e-05, %v620_v46 }
 0x263   :  { %v624_v50 = vmul.f32 %v911_v47, %v621_v44  ;;  %vm630_vm2 = vweird.f32 %v911_v47 }
 0x264   :  { %912 = vrsqrt.f32 %v622_v48  ;;  %vm631_vm4 = vmor %vm629_vm3, %vm630_vm2  ;;  %vm639_vm6 = vweird.f32 %v622_v48 }
 0x265   :  { %v625_v52 = vmul.f32 %v911_v47, %v624_v50 }
 0x267   :  { %v626_v53 = vmul.f32 0.5, %v625_v52 }
 0x269   :  { %v627_v54 = vsub.f32 1.5, %v626_v53 }
 0x26a   :  { %v913_v55 = vpop.eup %912 }
 0x26b   :  { %v628_v49 = vmul.f32 %v911_v47, %v627_v54  ;;  %v634_v56 = vmul.f32 %v913_v55, %v622_v48  ;;  %vm640_vm5 = vweird.f32 %v913_v55 }
 0x26c   :  { %vm641_vm7 = vmor %vm639_vm6, %vm640_vm5 }
 0x26d   :  { %v632_v58 = vsel %vm631_vm4, %v911_v47, %v628_v49  ;;  %v635_v23 = vmul.f32 %v913_v55, %v634_v56 }
 0x26e   :  { %v643_v32 = vmul.f32 %v632_v58, %v605_v26  ;;  %v644_v60 = vmul.f32 %v632_v58, %v606_v27 }
 0x26f   :  { %v636_v62 = vmul.f32 0.5, %v635_v23 }
 0x270   :  { %v654_v63 = vmul.f32 %v650_v19, %v643_v32  ;;  %v655_v0 = vmul.f32 %v651_v57, %v644_v60 }
 0x271   :  { %v637_v38 = vsub.f32 1.5, %v636_v62 }
 0x272   :  { %v665_v2 = vadd.f32 %v661_v59, %v654_v63  ;;  %v666_v3 = vadd.f32 %v662_v61, %v655_v0 }
 0x273   :  { %v638_v39 = vmul.f32 %v913_v55, %v637_v38 }
 0x274   :  { %669 = vst [vmem:[#allocation10] sm:$0xff] %v665_v2 }
 0x275   :  { %670 = vst [vmem:[#allocation10 + $0x8] sm:$0xff] %v666_v3  ;;  %v642_v4 = vsel %vm641_vm7, %v913_v55, %v638_v39 }
 0x276   :  { %v645_v1 = vmul.f32 %v642_v4, %v607_v34  ;;  %v646_v5 = vmul.f32 %v642_v4, %v608_v35 }
 0x278   :  { %v656_v6 = vmul.f32 %v650_v19, %v645_v1  ;;  %v657_v8 = vmul.f32 %v651_v57, %v646_v5 }
 0x27a   :  { %v667_v41 = vadd.f32 %v661_v59, %v656_v6  ;;  %v668_v51 = vadd.f32 %v662_v61, %v657_v8 }
 0x27c   :  { %671 = vst [vmem:[#allocation10 + $0x10] sm:$0xff] %v667_v41 }
 0x27d   :  { %672 = vst [vmem:[#allocation10 + $0x18] sm:$0xff] %v668_v51 }
 0x27e   :  { %685 = dma.vmem_to_hbm [thread:$0]  %s678_s3, 512, %s680_s11, [#allocation4], %s1050_s12, %s1050_s12, %s1051_s13  }
 0x27f   :  { %1040 = dma.done.wait [#allocation4], 512  }
 0x280   :  { %1041 = vsyncadd [#allocation4], 4294966784 }
 0x281   :  { %690 = vsyncpa [#allocation3], 1 }
 0x282   :  { %691 = vsyncpa [#allocation6], 1 }
 0x283   :  { %692 = vsyncpa [#allocation9], 1 }
 0x284   :  { %693 = vsyncpa [#allocation4], 1 }

// kernel: tpu_custom_call.1
= control target key start
LH: loop header
LB: loop body
LE: loop exit
PB: predicated region body
PF: predicated region fallthrough
CT: control target
= control target key end

     0   :  { %9 = vsyncpa [#allocation3], 0  ;;  %s1200_s0 = inlined_call_operand.hbm [shape: f32[16,48], index: 0, kind: input, shape index: {}]   ;;  %s1201_s1 = inlined_call_operand.hbm [shape: bf16[48,256], index: 1, kind: input, shape index: {}]   ;;  %s1202_s2 = inlined_call_operand.hbm [shape: bf16[256,256], index: 2, kind: input, shape index: {}]   ;;  %s1203_s3 = inlined_call_operand.hbm [shape: f32[4,256], index: 3, kind: input, shape index: {}]   ;;  %s1204_s4 = inlined_call_operand.hbm [shape: f32[16,256], index: 4, kind: output, shape index: {}]  }
   0x1   :  { %10 = vsyncpa [#allocation6], 0 }
   0x2   :  { %11 = vsyncpa [#allocation9], 0 }
   0x3   :  { %12 = vsyncpa [#allocation4], 0  ;;  %s30_s17 = sshll.u32 %s1201_s1, 4  ;;  %s1042_s18 = smov [#allocation5]   ;;  %s31_s17 = int_to_ptr.hbm [resolvable:$true] %s30_s17 }
   0x4   :  { %s32_s19 = sshll.u32 %s1042_s18, 4  ;;  %s17_s22 = sshll.u32 %s1200_s0, 4  ;;  %s33_s19 = int_to_ptr.vmem [resolvable:$true] %s32_s19  ;;  %s18_s22 = int_to_ptr.hbm [resolvable:$true] %s17_s22 }
   0x5   :  { %s1043_s23 = smov 128   ;;  %s1044_s24 = smov 8  }
   0x6   :  { %38 = dma.hbm_to_vmem [thread:$0]  %s31_s17, 768, %s33_s19, [#allocation6], %s1043_s23, %s1043_s23, %s1044_s24  }
   0x7   :  { %s1045_s25 = smov [#allocation2]   ;;  %s43_s29 = sshll.u32 %s1202_s2, 4  ;;  %s44_s29 = int_to_ptr.hbm [resolvable:$true] %s43_s29 }
   0x8   :  { %s19_s26 = sshll.u32 %s1045_s25, 4  ;;  %s57_s5 = sshll.u32 %s1203_s3, 4  ;;  %s20_s26 = int_to_ptr.vmem [resolvable:$true] %s19_s26  ;;  %s58_s5 = int_to_ptr.hbm [resolvable:$true] %s57_s5 }
   0x9   :  { %25 = dma.hbm_to_vmem [thread:$0]  %s18_s22, 256, %s20_s26, [#allocation3], %s1043_s23, %s1043_s23, %s1044_s24  }
   0xa   :  { %s1046_s6 = smov [#allocation7]   ;;  %s1047_s0 = smov [#allocation8]  }
   0xb   :  { %s45_s7 = sshll.u32 %s1046_s6, 4  ;;  %s59_s8 = sshll.u32 %s1047_s0, 4  ;;  %s46_s7 = int_to_ptr.vmem [resolvable:$true] %s45_s7  ;;  %s60_s8 = int_to_ptr.vmem [resolvable:$true] %s59_s8 }
   0xc   :  { %51 = dma.hbm_to_vmem [thread:$0]  %s44_s29, 4096, %s46_s7, [#allocation6], %s1043_s23, %s1043_s23, %s1044_s24  }
   0xd   :  { %62 = dma.hbm_to_vmem [thread:$0]  %s58_s5, 128, %s60_s8, [#allocation9]  }
   0xe   :  { %1034 = dma.done.wait [#allocation3], 256  }
   0xf   :  { %1035 = vsyncadd [#allocation3], 4294967040 }
  0x10   :  { %1036 = dma.done.wait [#allocation6], 4864  }
  0x11   :  { %1037 = vsyncadd [#allocation6], 4294962432 }
  0x12   :  { %1038 = dma.done.wait [#allocation9], 128  }
  0x13   :  { %1039 = vsyncadd [#allocation9], 4294967168  ;;  %v712_v0 = vld [vmem:[#allocation5 + $0x20] sm:$0xf]  ;;  %v857_v1 = vld [vmem:[#allocation5 + $0x24] sm:$0xf0] }
  0x14   :  { %v856_v2 = vld [vmem:[#allocation5 + $0x24] sm:$0xf]  ;;  %v713_v3 = vor.u32 %v857_v1, %v712_v0  ;;  %v714_v4 = vld [vmem:[#allocation5 + $0x28] sm:$0xf0]  ;;  %v704_v5 = vld [vmem:[#allocation5 + $0x10] sm:$0xf] }
  0x15   :  { %v855_v6 = vld [vmem:[#allocation5 + $0x14] sm:$0xf0]  ;;  %v717_v7 = vor.u32 %v856_v2, %v714_v4  ;;  %v854_v8 = vld [vmem:[#allocation5 + $0x14] sm:$0xf]  ;;  %v706_v9 = vld [vmem:[#allocation5 + $0x18] sm:$0xf0] }
  0x16   :  { %134 = vmatpush.bf16.msra.mxu0 %v713_v3  ;;  %v705_v10 = vor.u32 %v855_v6, %v704_v5  ;;  %v709_v11 = vor.u32 %v854_v8, %v706_v9  ;;  %v696_v12 = vld [vmem:[#allocation5] sm:$0xf]  ;;  %v853_v13 = vld [vmem:[#allocation5 + $0x4] sm:$0xf0]  ;;  %v852_v14 = vld [vmem:[#allocation5 + $0x4] sm:$0xf] }
  0x17   :  { %148 = vmatpush.bf16.msra.mxu1 %v717_v7  ;;  %v698_v15 = vld [vmem:[#allocation5 + $0x8] sm:$0xf0]  ;;  %v697_v16 = vor.u32 %v853_v13, %v696_v12  ;;  %v80_v17 = vld [vmem:[#allocation2] sm:$0xff]  ;;  %v81_v18 = vld [vmem:[#allocation2 + $0x8] sm:$0xff]  ;;  %vm125_vm0 = vcmask 392192   ;;  %s1049_s2 = smov [#allocation10]  }
  0x18   :  { %v701_v19 = vor.u32 %v852_v14, %v698_v15  ;;  %v82_v20 = vpack.c.bf16 %v81_v18, %v80_v17  ;;  %v89_v21 = vld [vmem:[#allocation8] ss:$4 sm:$0x3]  ;;  %v782_v24 = vld [vmem:[#allocation7 + $0x70] sm:$0xf]  ;;  %s677_s3 = sshll.u32 %s1049_s2, 4  ;;  %s678_s3 = int_to_ptr.vmem [resolvable:$true] %s677_s3 }
  0x19   :  { %v91_v22 = vperm.slane %v89_v21, 0  ;;  %v92_v23 = vperm.slane %v89_v21, 1  ;;  %v873_v25 = vld [vmem:[#allocation7 + $0x74] sm:$0xf0]  ;;  %v846_v26 = vld [vmem:[#allocation7 + $0xf0] sm:$0xf] }
  0x1a   :  { %135 = vmatpush.bf16.msra.mxu0 %v705_v10  ;;  %v783_v28 = vor.u32 %v873_v25, %v782_v24  ;;  %v889_v29 = vld [vmem:[#allocation7 + $0xf4] sm:$0xf0]  ;;  %v872_v30 = vld [vmem:[#allocation7 + $0x74] sm:$0xf]  ;;  %v784_v31 = vld [vmem:[#allocation7 + $0x78] sm:$0xf0] }
  0x1b   :  { %149 = vmatpush.bf16.msra.mxu1 %v709_v11  ;;  %v847_v34 = vor.u32 %v889_v29, %v846_v26  ;;  %v787_v35 = vor.u32 %v872_v30, %v784_v31  ;;  %v888_v36 = vld [vmem:[#allocation7 + $0xf4] sm:$0xf]  ;;  %v848_v37 = vld [vmem:[#allocation7 + $0xf8] sm:$0xf0]  ;;  %v774_v40 = vld [vmem:[#allocation7 + $0x60] sm:$0xf] }
  0x1c   :  { %534 = vmatpush.bf16.msra.mxu2 %v783_v28  ;;  %v851_v38 = vor.u32 %v888_v36, %v848_v37  ;;  %v871_v42 = vld [vmem:[#allocation7 + $0x64] sm:$0xf0]  ;;  %v838_v44 = vld [vmem:[#allocation7 + $0xe0] sm:$0xf]  ;;  %v870_v46 = vld [vmem:[#allocation7 + $0x64] sm:$0xf] }
  0x1d   :  { %548 = vmatpush.bf16.msra.mxu3 %v847_v34  ;;  %v775_v43 = vor.u32 %v871_v42, %v774_v40  ;;  %v887_v45 = vld [vmem:[#allocation7 + $0xe4] sm:$0xf0]  ;;  %v776_v48 = vld [vmem:[#allocation7 + $0x68] sm:$0xf0]  ;;  %v886_v49 = vld [vmem:[#allocation7 + $0xe4] sm:$0xf] }
  0x1e   :  { %136 = vmatpush.bf16.msra.mxu0 %v697_v16  ;;  %v839_v47 = vor.u32 %v887_v45, %v838_v44  ;;  %v840_v50 = vld [vmem:[#allocation7 + $0xe8] sm:$0xf0]  ;;  %v779_v52 = vor.u32 %v870_v46, %v776_v48  ;;  %v766_v54 = vld [vmem:[#allocation7 + $0x50] sm:$0xf]  ;;  %v869_v55 = vld [vmem:[#allocation7 + $0x54] sm:$0xf0] }
  0x1f   :  { %150 = vmatpush.bf16.msra.mxu1 %v701_v19  ;;  %v843_v53 = vor.u32 %v886_v49, %v840_v50  ;;  %v767_v57 = vor.u32 %v869_v55, %v766_v54  ;;  %v830_v58 = vld [vmem:[#allocation7 + $0xd0] sm:$0xf]  ;;  %v885_v59 = vld [vmem:[#allocation7 + $0xd4] sm:$0xf0]  ;;  %v868_v63 = vld [vmem:[#allocation7 + $0x54] sm:$0xf] }
  0x20   :  { %535 = vmatpush.bf16.msra.mxu2 %v775_v43  ;;  %v831_v62 = vor.u32 %v885_v59, %v830_v58  ;;  %v768_v0 = vld [vmem:[#allocation7 + $0x58] sm:$0xf0]  ;;  %v884_v3 = vld [vmem:[#allocation7 + $0xd4] sm:$0xf]  ;;  %v758_v11 = vld [vmem:[#allocation7 + $0x40] sm:$0xf] }
  0x21   :  { %718 = vmatmul.msk.bf16.vlgmr.msra.gmra.mxu0 %vm125_vm0, %v82_v20  ;;  %549 = vmatpush.bf16.msra.mxu3 %v839_v47  ;;  %v771_v2 = vor.u32 %v868_v63, %v768_v0  ;;  %v832_v4 = vld [vmem:[#allocation7 + $0xd8] sm:$0xf0]  ;;  %v867_v12 = vld [vmem:[#allocation7 + $0x44] sm:$0xf0]  ;;  %v822_v13 = vld [vmem:[#allocation7 + $0xc0] sm:$0xf] }
  0x22   :  { %719 = vmatmul.msk.bf16.vlgmr.msra.gmra.mxu1 %vm125_vm0, %v82_v20  ;;  %562 = vmatpush.bf16.msrb.mxu0 %v787_v35  ;;  %v835_v8 = vor.u32 %v884_v3, %v832_v4  ;;  %v759_v14 = vor.u32 %v867_v12, %v758_v11  ;;  %v883_v15 = vld [vmem:[#allocation7 + $0xc4] sm:$0xf0]  ;;  %v866_v16 = vld [vmem:[#allocation7 + $0x44] sm:$0xf]  ;;  %v760_v17 = vld [vmem:[#allocation7 + $0x48] sm:$0xf0] }
  0x23   :  { %576 = vmatpush.bf16.msrb.mxu1 %v851_v38  ;;  %v823_v20 = vor.u32 %v883_v15, %v822_v13  ;;  %v763_v21 = vor.u32 %v866_v16, %v760_v17  ;;  %v824_v25 = vld [vmem:[#allocation7 + $0xc8] sm:$0xf0]  ;;  %v865_v28 = vld [vmem:[#allocation7 + $0x34] sm:$0xf0]  ;;  %v814_v30 = vld [vmem:[#allocation7 + $0xb0] sm:$0xf] }
  0x24   :  { %536 = vmatpush.bf16.msra.mxu2 %v767_v57  ;;  %v881_v31 = vld [vmem:[#allocation7 + $0xb4] sm:$0xf0]  ;;  %v864_v36 = vld [vmem:[#allocation7 + $0x34] sm:$0xf]  ;;  %v752_v40 = vld [vmem:[#allocation7 + $0x38] sm:$0xf0] }
  0x25   :  { %550 = vmatpush.bf16.msra.mxu3 %v831_v62  ;;  %v815_v35 = vor.u32 %v881_v31, %v814_v30  ;;  %v755_v42 = vor.u32 %v864_v36, %v752_v40  ;;  %v880_v43 = vld [vmem:[#allocation7 + $0xb4] sm:$0xf]  ;;  %v816_v44 = vld [vmem:[#allocation7 + $0xb8] sm:$0xf0]  ;;  %v742_v45 = vld [vmem:[#allocation7 + $0x20] sm:$0xf] }
  0x26   :  { %563 = vmatpush.bf16.msrb.mxu0 %v779_v52  ;;  %v819_v46 = vor.u32 %v880_v43, %v816_v44  ;;  %v863_v47 = vld [vmem:[#allocation7 + $0x24] sm:$0xf0]  ;;  %v806_v48 = vld [vmem:[#allocation7 + $0xa0] sm:$0xf]  ;;  %v862_v55 = vld [vmem:[#allocation7 + $0x24] sm:$0xf] }
  0x27   :  { %577 = vmatpush.bf16.msrb.mxu1 %v843_v53  ;;  %v879_v49 = vld [vmem:[#allocation7 + $0xa4] sm:$0xf0]  ;;  %v743_v53 = vor.u32 %v863_v47, %v742_v45  ;;  %v744_v58 = vld [vmem:[#allocation7 + $0x28] sm:$0xf0]  ;;  %v734_v63 = vld [vmem:[#allocation7 + $0x10] sm:$0xf] }
  0x28   :  { %537 = vmatpush.bf16.msra.mxu2 %v759_v14  ;;  %v807_v54 = vor.u32 %v879_v49, %v806_v48  ;;  %v747_v59 = vor.u32 %v862_v55, %v744_v58  ;;  %v808_v62 = vld [vmem:[#allocation7 + $0xa8] sm:$0xf0]  ;;  %v798_v3 = vld [vmem:[#allocation7 + $0x90] sm:$0xf]  ;;  %v877_v4 = vld [vmem:[#allocation7 + $0x94] sm:$0xf0] }
  0x29   :  { %551 = vmatpush.bf16.msra.mxu3 %v823_v20  ;;  %v736_v13 = vld [vmem:[#allocation7 + $0x18] sm:$0xf0]  ;;  %v876_v16 = vld [vmem:[#allocation7 + $0x94] sm:$0xf]  ;;  %v726_v20 = vld [vmem:[#allocation7] sm:$0xf] }
  0x2a   :  { %564 = vmatpush.bf16.msrb.mxu0 %v771_v2  ;;  %v861_v2 = vld [vmem:[#allocation7 + $0x14] sm:$0xf0]  ;;  %v800_v17 = vld [vmem:[#allocation7 + $0x98] sm:$0xf0]  ;;  %v728_v30 = vld [vmem:[#allocation7 + $0x8] sm:$0xf0] }
  0x2b   :  { %578 = vmatpush.bf16.msrb.mxu1 %v835_v8  ;;  %v799_v8 = vor.u32 %v877_v4, %v798_v3  ;;  %v792_v36 = vld [vmem:[#allocation7 + $0x88] sm:$0xf0]  ;;  %s679_s11 = sshll.u32 %s1204_s4, 4  ;;  %s1050_s12 = smov 256   ;;  %s680_s11 = int_to_ptr.hbm [resolvable:$true] %s679_s11 }
  0x2c   :  { %s1051_s13 = smov 16  }
  0x2d   :  { %552 = vmatpush.bf16.msra.mxu3 %v815_v35  ;;  %v874_v35 = vld [vmem:[#allocation7 + $0x84] sm:$0xf] }
  0x2e   :  { %565 = vmatpush.bf16.msrb.mxu0 %v763_v21  ;;  %v803_v21 = vor.u32 %v876_v16, %v800_v17  ;;  %v795_v40 = vor.u32 %v874_v35, %v792_v36 }
  0x31   :  { %553 = vmatpush.bf16.msra.mxu3 %v807_v54 }
  0x32   :  { %566 = vmatpush.bf16.msrb.mxu0 %v755_v42 }
  0x35   :  { %554 = vmatpush.bf16.msra.mxu3 %v799_v8 }
  0x36   :  { %567 = vmatpush.bf16.msrb.mxu0 %v747_v59 }
  0x9e   :  { %v138_v27 = vpop.f32.mrf.mxu0 }
  0x9f   :  { %v1089_v32 = vadd.f32 %v138_v27, %v91_v22  ;;  %v152_v33 = vpop.f32.mrf.mxu1  ;;  %v750_v27 = vld [vmem:[#allocation7 + $0x30] sm:$0xf] }
  0xa0   :  { %v1091_v39 = vadd.f32 %v152_v33, %v92_v23  ;;  %v751_v29 = vor.u32 %v865_v28, %v750_v27 }
  0xa1   :  { %v1094_v41 = vmul.f32 0.70710677, %v1089_v32 }
  0xa2   :  { %v1097_v51 = vmul.f32 0.70710677, %v1091_v39  ;;  %538 = vmatpush.bf16.msra.mxu2 %v751_v29  ;;  %v858_v29 = vld [vmem:[#allocation7 + $0x4] sm:$0xf] }
  0xa3   :  { %v165_v5 = vmul.f32 %v1094_v41, %v1094_v41 }
  0xa4   :  { %v205_v6 = vmul.f32 %v1097_v51, %v1097_v51 }
  0xa5   :  { %v1115_v18 = vmin.f32 %v165_v5, 16.0 }
  0xa6   :  { %v140_v56 = vpop.f32.mrf.mxu0  ;;  %v1117_v19 = vmin.f32 %v205_v6, 16.0  ;;  %539 = vmatpush.bf16.msra.mxu2 %v743_v53  ;;  %v735_v6 = vor.u32 %v861_v2, %v734_v63 }
  0xa7   :  { %v1099_v60 = vadd.f32 %v140_v56, %v91_v22  ;;  %v154_v61 = vpop.f32.mrf.mxu1  ;;  %v882_v22 = vld [vmem:[#allocation7 + $0xc4] sm:$0xf]  ;;  %v167_v33 = vmul.f32 2.1237322e-06, %v1115_v18  ;;  %v178_v42 = vmul.f32 3.8918573e-05, %v1115_v18 }
  0xa8   :  { %v1101_v1 = vadd.f32 %v154_v61, %v92_v23  ;;  %v827_v26 = vor.u32 %v882_v22, %v824_v25  ;;  %v207_v34 = vmul.f32 2.1237322e-06, %v1117_v19  ;;  %v878_v61 = vld [vmem:[#allocation7 + $0xa4] sm:$0xf]  ;;  %v859_v22 = vld [vmem:[#allocation7 + $0x4] sm:$0xf0] }
  0xa9   :  { %v1108_v7 = vmul.f32 0.70710677, %v1099_v60  ;;  %v168_v50 = vadd.f32 0.00028619796, %v167_v33  ;;  %v811_v0 = vor.u32 %v878_v61, %v808_v62  ;;  %v875_v25 = vld [vmem:[#allocation7 + $0x84] sm:$0xf0]  ;;  %v727_v27 = vor.u32 %v859_v22, %v726_v20 }
  0xaa   :  { %v1111_v9 = vmul.f32 0.70710677, %v1101_v1  ;;  %579 = vmatpush.bf16.msrb.mxu1 %v827_v26  ;;  %v208_v52 = vadd.f32 0.00028619796, %v207_v34  ;;  %540 = vmatpush.bf16.msra.mxu2 %v735_v6  ;;  %v731_v34 = vor.u32 %v858_v29, %v728_v30  ;;  %v218_v44 = vmul.f32 3.8918573e-05, %v1117_v19 }
  0xab   :  { %v245_v10 = vmul.f32 %v1108_v7, %v1108_v7  ;;  %v169_v5 = vmul.f32 %v168_v50, %v1115_v18  ;;  %v179_v47 = vadd.f32 0.001143296, %v178_v42 }
  0xac   :  { %v285_v24 = vmul.f32 %v1111_v9, %v1111_v9  ;;  %v209_v11 = vmul.f32 %v208_v52, %v1117_v19  ;;  %v219_v52 = vadd.f32 0.001143296, %v218_v44 }
  0xad   :  { %v1119_v23 = vmin.f32 %v245_v10, 16.0  ;;  %v860_v10 = vld [vmem:[#allocation7 + $0x14] sm:$0xf]  ;;  %v170_v26 = vadd.f32 0.0036580483, %v169_v5  ;;  %v180_v55 = vmul.f32 %v179_v47, %v1115_v18 }
  0xae   :  { %v1126_v38 = vmin.f32 %v285_v24, 16.0  ;;  %580 = vmatpush.bf16.msrb.mxu1 %v819_v46  ;;  %v739_v15 = vor.u32 %v860_v10, %v736_v13  ;;  %v790_v24 = vld [vmem:[#allocation7 + $0x80] sm:$0xf]  ;;  %v210_v31 = vadd.f32 0.0036580483, %v209_v11  ;;  %541 = vmatpush.bf16.msra.mxu2 %v727_v27 }
  0xaf   :  { %v247_v37 = vmul.f32 2.1237322e-06, %v1119_v23  ;;  %v791_v28 = vor.u32 %v875_v25, %v790_v24  ;;  %v258_v43 = vmul.f32 3.8918573e-05, %v1119_v23  ;;  %v171_v46 = vmul.f32 %v170_v26, %v1115_v18 }
  0xb0   :  { %v287_v57 = vmul.f32 2.1237322e-06, %v1126_v38  ;;  %568 = vmatpush.bf16.msrb.mxu0 %v739_v15  ;;  %v298_v45 = vmul.f32 3.8918573e-05, %v1126_v38  ;;  %v211_v49 = vmul.f32 %v210_v31, %v1117_v19  ;;  %v181_v61 = vadd.f32 0.014752088, %v180_v55 }
  0xb1   :  { %v248_v56 = vadd.f32 0.00028619796, %v247_v37  ;;  %555 = vmatpush.bf16.msra.mxu3 %v791_v28  ;;  %v259_v48 = vadd.f32 0.001143296, %v258_v43  ;;  %v172_v59 = vadd.f32 0.05243302, %v171_v46 }
  0xb2   :  { %v288_v12 = vadd.f32 0.00028619796, %v287_v57  ;;  %581 = vmatpush.bf16.msrb.mxu1 %v811_v0  ;;  %v299_v53 = vadd.f32 0.001143296, %v298_v45  ;;  %v220_v57 = vmul.f32 %v219_v52, %v1117_v19  ;;  %v212_v63 = vadd.f32 0.05243302, %v211_v49 }
  0xb3   :  { %v249_v14 = vmul.f32 %v248_v56, %v1119_v23  ;;  %v260_v56 = vmul.f32 %v259_v48, %v1119_v23  ;;  %v182_v5 = vmul.f32 %v181_v61, %v1115_v18  ;;  %v173_v11 = vmul.f32 %v172_v59, %v1115_v18 }
  0xb4   :  { %v289_v33 = vmul.f32 %v288_v12, %v1126_v38  ;;  %569 = vmatpush.bf16.msrb.mxu0 %v731_v34  ;;  %v300_v58 = vmul.f32 %v299_v53, %v1126_v38  ;;  %v221_v2 = vadd.f32 0.014752088, %v220_v57 }
  0xb5   :  { %v250_v37 = vadd.f32 0.0036580483, %v249_v14  ;;  %v261_v62 = vadd.f32 0.014752088, %v260_v56  ;;  %v183_v12 = vadd.f32 0.112945676, %v182_v5  ;;  %v213_v14 = vmul.f32 %v212_v63, %v1117_v19 }
  0xb6   :  { %582 = vmatpush.bf16.msrb.mxu1 %v803_v21  ;;  %v290_v50 = vadd.f32 0.0036580483, %v289_v33  ;;  %v301_v3 = vadd.f32 0.014752088, %v300_v58  ;;  %v222_v8 = vmul.f32 %v221_v2, %v1117_v19  ;;  %v174_v26 = vadd.f32 0.18741608, %v173_v11 }
  0xb7   :  { %v251_v54 = vmul.f32 %v250_v37, %v1119_v23  ;;  %v262_v6 = vmul.f32 %v261_v62, %v1119_v23  ;;  %v184_v21 = vmul.f32 %v183_v12, %v1115_v18  ;;  %v214_v29 = vadd.f32 0.18741608, %v213_v14 }
  0xb8   :  { %v291_v0 = vmul.f32 %v290_v50, %v1126_v38  ;;  %v302_v10 = vmul.f32 %v301_v3, %v1126_v38  ;;  %v223_v16 = vadd.f32 0.112945676, %v222_v8  ;;  %v175_v44 = vmul.f32 %v174_v26, %v1115_v18 }
  0xb9   :  { %v252_v4 = vadd.f32 0.05243302, %v251_v54  ;;  %v263_v13 = vadd.f32 0.112945676, %v262_v6  ;;  %v185_v27 = vadd.f32 0.4994258, %v184_v21  ;;  %v215_v45 = vmul.f32 %v214_v29, %v1117_v19 }
  0xba   :  { %583 = vmatpush.bf16.msrb.mxu1 %v795_v40  ;;  %v292_v15 = vadd.f32 0.05243302, %v291_v0  ;;  %v303_v17 = vadd.f32 0.112945676, %v302_v10  ;;  %v224_v24 = vmul.f32 %v223_v16, %v1117_v19  ;;  %v176_v50 = vadd.f32 1.1283791, %v175_v44 }
  0xbb   :  { %v253_v20 = vmul.f32 %v252_v4, %v1119_v23  ;;  %v264_v22 = vmul.f32 %v263_v13, %v1119_v23  ;;  %v186_v35 = vmul.f32 %v185_v27, %v1115_v18  ;;  %v216_v52 = vadd.f32 1.1283791, %v215_v45 }
  0xbc   :  { %v304_v25 = vmul.f32 %v303_v17, %v1126_v38  ;;  %v293_v30 = vmul.f32 %v292_v15, %v1126_v38  ;;  %v225_v31 = vadd.f32 0.4994258, %v224_v24 }
  0xbd   :  { %v265_v28 = vadd.f32 0.4994258, %v264_v22  ;;  %v254_v34 = vadd.f32 0.18741608, %v253_v20  ;;  %v187_v42 = vadd.f32 1.0, %v186_v35  ;;  %v217_v59 = vmul.f32 %v216_v52, %v1097_v51 }
  0xbe   :  { %v305_v33 = vadd.f32 0.4994258, %v304_v25  ;;  %v226_v37 = vmul.f32 %v225_v31, %v1117_v19  ;;  %v294_v46 = vadd.f32 0.18741608, %v293_v30  ;;  %v157_v52 = vmul.f32 0.5, %v1089_v32 }
  0xbf   :  { %v266_v36 = vmul.f32 %v265_v28, %v1119_v23  ;;  %v255_v48 = vmul.f32 %v254_v34, %v1119_v23  ;;  %900 = vrcp.f32 %v187_v42  ;;  %v197_v55 = vand.u32 2147483647, %v187_v42  ;;  %v368_v32 = vld [vmem:[#allocation8 + $0x1] ss:$4 sm:$0x3] }
  0xc0   :  { %v306_v40 = vmul.f32 %v305_v33, %v1126_v38  ;;  %v227_v47 = vadd.f32 1.0, %v226_v37  ;;  %v295_v53 = vmul.f32 %v294_v46, %v1126_v38  ;;  %v199_v18 = vand.u32 2147483648, %v187_v42 }
  0xc1   :  { %v267_v43 = vadd.f32 1.0, %v266_v36  ;;  %v256_v54 = vadd.f32 1.1283791, %v255_v48  ;;  %v177_v23 = vmul.f32 %v176_v50, %v1094_v41  ;;  %vm193_vm1 = vweird.f32 %v187_v42 }
  0xc2   :  { %v1164_v49 = vadd.f32 1.0, %v306_v40  ;;  %v296_v61 = vadd.f32 1.1283791, %v295_v53  ;;  %vm1171_vm3 = vcmp.eq.f32.partialorder %v197_v55, 8.507059e+37  ;;  %v200_v4 = vor.u32 1.1754944e-38, %v199_v18 }
  0xc3   :  { %902 = vrcp.f32 %v267_v43  ;;  %v277_v19 = vand.u32 2147483647, %v267_v43  ;;  %v279_v57 = vand.u32 2147483648, %v267_v43  ;;  %v257_v0 = vmul.f32 %v256_v54, %v1108_v7 }
  0xc4   :  { %904 = vrcp.f32 %v227_v47  ;;  %vm273_vm2 = vweird.f32 %v267_v43  ;;  %vm233_vm5 = vweird.f32 %v227_v47  ;;  %v237_v13 = vand.u32 2147483647, %v227_v47 }
  0xc5   :  { %906 = vrcp.f32 %v1164_v49  ;;  %v901_v56 = vpop.eup %900  ;;  %vm1175_vm4 = vcmp.eq.f32.partialorder %v277_v19, 8.507059e+37  ;;  %v280_v51 = vor.u32 1.1754944e-38, %v279_v57  ;;  %v239_v14 = vand.u32 2147483648, %v227_v47 }
  0xc6   :  { %v189_v62 = vmul.f32 %v901_v56, %v187_v42  ;;  %vm194_vm6 = vweird.f32 %v901_v56  ;;  %vm313_vm10 = vweird.f32 %v1164_v49  ;;  %v317_v21 = vand.u32 2147483647, %v1164_v49 }
  0xc7   :  { %vm195_vm9 = vmor %vm193_vm1, %vm194_vm6  ;;  %v319_v22 = vand.u32 2147483648, %v1164_v49  ;;  %vm238_vm14 = vcmp.eq.f32.partialorder %v237_v13, 8.507059e+37  ;;  %v240_v29 = vor.u32 1.1754944e-38, %v239_v14  ;;  %v297_v35 = vmul.f32 %v296_v61, %v1111_v9 }
  0xc8   :  { %v190_v2 = vsub.f32 1.0, %v189_v62  ;;  %vm318_vm0 = vcmp.eq.f32.partialorder %v317_v21, 8.507059e+37  ;;  %v159_v53 = vmul.f32 0.5, %v1099_v60  ;;  %v160_v19 = vmul.f32 0.5, %v1101_v1 }
  0xc9   :  { %v903_v58 = vpop.eup %902  ;;  %v320_v40 = vor.u32 1.1754944e-38, %v319_v22  ;;  %v371_v62 = vperm.slane %v368_v32, 1  ;;  %v1048_v14 = vmov 256.0  }
  0xca   :  { %v905_v63 = vpop.eup %904  ;;  %v269_v38 = vmul.f32 %v903_v58, %v267_v43  ;;  %v191_v10 = vmul.f32 %v901_v56, %v190_v2  ;;  %vm274_vm7 = vweird.f32 %v903_v58  ;;  %908 = vrcp.f32 %v1048_v14 }
  0xcb   :  { %v229_v5 = vmul.f32 %v905_v63, %v227_v47  ;;  %v907_v6 = vpop.eup %906  ;;  %vm234_vm8 = vweird.f32 %v905_v63  ;;  %vm275_vm11 = vmor %vm273_vm2, %vm274_vm7 }
  0xcc   :  { %v270_v8 = vsub.f32 1.0, %v269_v38  ;;  %v309_v11 = vmul.f32 %v907_v6, %v1164_v49  ;;  %v192_v15 = vadd.f32 %v901_v56, %v191_v10  ;;  %vm314_vm12 = vweird.f32 %v907_v6  ;;  %vm235_vm13 = vmor %vm233_vm5, %vm234_vm8 }
  0xcd   :  { %v230_v7 = vsub.f32 1.0, %v229_v5  ;;  %vm315_vm15 = vmor %vm313_vm10, %vm314_vm12 }
  0xce   :  { %v271_v12 = vmul.f32 %v903_v58, %v270_v8  ;;  %v310_v17 = vsub.f32 1.0, %v309_v11  ;;  %v196_v24 = vsel %vm195_vm9, %v901_v56, %v192_v15  ;;  %v158_v56 = vmul.f32 0.5, %v1091_v39 }
  0xcf   :  { %v231_v16 = vmul.f32 %v905_v63, %v230_v7  ;;  %v201_v27 = vsel %vm1171_vm3, %v200_v4, %v196_v24 }
  0xd0   :  { %v272_v20 = vadd.f32 %v903_v58, %v271_v12  ;;  %v311_v26 = vmul.f32 %v907_v6, %v310_v17  ;;  %v202_v30 = vmul.f32 %v201_v27, %v177_v23  ;;  %v909_v15 = vpop.eup %908 }
  0xd1   :  { %v232_v25 = vadd.f32 %v905_v63, %v231_v16  ;;  %v597_v16 = vmul.f32 256.0, %v909_v15  ;;  %vm601_vm1 = vweird.f32 %v909_v15 }
  0xd2   :  { %v276_v28 = vsel %vm275_vm11, %v903_v58, %v272_v20  ;;  %v312_v34 = vadd.f32 %v907_v6, %v311_v26  ;;  %v720_v42 = vclamps-f32 %v202_v30, 1.0 }
  0xd3   :  { %v281_v31 = vsel %vm1175_vm4, %v280_v51, %v276_v28  ;;  %v236_v33 = vsel %vm235_vm13, %v905_v63, %v232_v25  ;;  %v370_v63 = vperm.slane %v368_v32, 0  ;;  %v598_v17 = vsub.f32 1.0, %v597_v16 }
  0xd4   :  { %v282_v36 = vmul.f32 %v281_v31, %v257_v0  ;;  %v241_v37 = vsel %vm238_vm14, %v240_v29, %v236_v33  ;;  %v316_v44 = vsel %vm315_vm15, %v907_v6, %v312_v34  ;;  %v325_v47 = vadd.f32 1.0, %v720_v42 }
  0xd5   :  { %v242_v43 = vmul.f32 %v241_v37, %v217_v59  ;;  %v321_v46 = vsel %vm318_vm0, %v320_v40, %v316_v44  ;;  %v599_v20 = vmul.f32 %v909_v15, %v598_v17 }
  0xd6   :  { %v722_v45 = vclamps-f32 %v282_v36, 1.0  ;;  %v322_v50 = vmul.f32 %v321_v46, %v297_v35  ;;  %v329_v18 = vmul.f32 %v325_v47, %v157_v52 }
  0xd7   :  { %v721_v48 = vclamps-f32 %v242_v43, 1.0  ;;  %v600_v21 = vadd.f32 %v909_v15, %v599_v20 }
  0xd8   :  { %v327_v9 = vadd.f32 1.0, %v722_v45  ;;  %v723_v54 = vclamps-f32 %v322_v50, 1.0 }
  0xd9   :  { %v326_v55 = vadd.f32 1.0, %v721_v48  ;;  %v602_v22 = vsel %vm601_vm1, %v909_v15, %v600_v21 }
  0xda   :  { %v331_v49 = vmul.f32 %v327_v9, %v159_v53  ;;  %v328_v57 = vadd.f32 1.0, %v723_v54  ;;  %v648_v9 = vld [vmem:[#allocation8 + $0x2] ss:$4 sm:$0x3] }
  0xdb   :  { %v330_v23 = vmul.f32 %v326_v55, %v158_v56 }
  0xdc   :  { %v333_v58 = vpack.c.bf16 %v331_v49, %v329_v18  ;;  %v332_v59 = vmul.f32 %v328_v57, %v160_v19  ;;  %v659_v18 = vld [vmem:[#allocation8 + $0x3] ss:$4 sm:$0x3]  ;;  %v650_v19 = vperm.slane %v648_v9, 0  ;;  %v651_v57 = vperm.slane %v648_v9, 1 }
  0xde   :  { %542 = vmatmul.bf16.vlgmr.msra.gmra.mxu2 %v333_v58  ;;  %570 = vmatmul.bf16.vlgmr.msrb.gmra.mxu0 %v333_v58  ;;  %v334_v61 = vpack.c.bf16 %v332_v59, %v330_v23  ;;  %v661_v59 = vperm.slane %v659_v18, 0 }
  0xe0   :  { %556 = vmatmul.bf16.vlgmr.msra.gmra.mxu3 %v334_v61  ;;  %584 = vmatmul.bf16.vlgmr.msrb.gmra.mxu1 %v334_v61  ;;  %v662_v61 = vperm.slane %v659_v18, 1 }
 0x15b   :  { %v571_v60 = vpop.f32.mrf.mxu0 }
 0x15c   :  { %v572_v0 = vadd.f32 %v571_v60, %v371_v62 }
 0x15d   :  { %v585_v2 = vpop.f32.mrf.mxu1 }
 0x15e   :  { %v586_v4 = vadd.f32 %v585_v2, %v572_v0 }
 0x161   :  { %v543_v38 = vpop.f32.mrf.mxu2 }
 0x162   :  { %v544_v3 = vadd.f32 %v543_v38, %v370_v63 }
 0x163   :  { %v557_v39 = vpop.f32.mrf.mxu3  ;;  %v573_v5 = vpop.f32.mrf.mxu0 }
 0x164   :  { %v558_v1 = vadd.f32 %v557_v39, %v544_v3  ;;  %v574_v8 = vadd.f32 %v573_v5, %v371_v62 }
 0x165   :  { %v587_v10 = vpop.f32.mrf.mxu1 }
 0x166   :  { %v590_v6 = vadd.f32 %v586_v4, %v558_v1  ;;  %v588_v11 = vadd.f32 %v587_v10, %v574_v8 }
 0x168   :  { %591 = vadd.xlane.f32.xlu0 %v590_v6 }
 0x169   :  { %v545_v41 = vpop.f32.mrf.mxu2 }
 0x16a   :  { %v546_v51 = vadd.f32 %v545_v41, %v370_v63 }
 0x16b   :  { %v559_v7 = vpop.f32.mrf.mxu3 }
 0x16c   :  { %v560_v12 = vadd.f32 %v559_v7, %v546_v51 }
 0x16e   :  { %v593_v13 = vadd.f32 %v588_v11, %v560_v12 }
 0x170   :  { %594 = vadd.xlane.f32.xlu0 %v593_v13 }
 0x1db   :  { %v592_v24 = vpop.xlane.xlu0 %591 }
 0x1dc   :  { %v603_v25 = vmul.f32 %v602_v22, %v592_v24 }
 0x1de   :  { %v605_v26 = vsub.f32 %v558_v1, %v603_v25  ;;  %v606_v27 = vsub.f32 %v586_v4, %v603_v25 }
 0x1e0   :  { %v609_v28 = vmul.f32 %v605_v26, %v605_v26  ;;  %v610_v29 = vmul.f32 %v606_v27, %v606_v27 }
 0x1e2   :  { %v613_v30 = vadd.f32 %v610_v29, %v609_v28 }
 0x1e3   :  { %v595_v31 = vpop.xlane.xlu0 %594 }
 0x1e4   :  { %v604_v33 = vmul.f32 %v602_v22, %v595_v31  ;;  %614 = vadd.xlane.f32.xlu1 %v613_v30 }
 0x1e6   :  { %v607_v34 = vsub.f32 %v560_v12, %v604_v33  ;;  %v608_v35 = vsub.f32 %v588_v11, %v604_v33 }
 0x1e8   :  { %v611_v36 = vmul.f32 %v607_v34, %v607_v34  ;;  %v612_v37 = vmul.f32 %v608_v35, %v608_v35 }
 0x1ea   :  { %v616_v40 = vadd.f32 %v612_v37, %v611_v36 }
 0x1ec   :  { %617 = vadd.xlane.f32.xlu1 %v616_v40 }
 0x257   :  { %v615_v42 = vpop.xlane.xlu1 %614 }
 0x258   :  { %v619_v43 = vmul.f32 %v615_v42, %v602_v22 }
 0x25a   :  { %v621_v44 = vadd.f32 1e-05, %v619_v43 }
 0x25c   :  { %910 = vrsqrt.f32 %v621_v44  ;;  %vm629_vm3 = vweird.f32 %v621_v44 }
 0x25f   :  { %v618_v45 = vpop.xlane.xlu1 %617 }
 0x260   :  { %v620_v46 = vmul.f32 %v618_v45, %v602_v22 }
 0x262   :  { %v911_v47 = vpop.eup %910  ;;  %v622_v48 = vadd.f32 1e-05, %v620_v46 }
 0x263   :  { %v624_v50 = vmul.f32 %v911_v47, %v621_v44  ;;  %vm630_vm2 = vweird.f32 %v911_v47 }
 0x264   :  { %912 = vrsqrt.f32 %v622_v48  ;;  %vm631_vm4 = vmor %vm629_vm3, %vm630_vm2  ;;  %vm639_vm6 = vweird.f32 %v622_v48 }
 0x265   :  { %v625_v52 = vmul.f32 %v911_v47, %v624_v50 }
 0x267   :  { %v626_v53 = vmul.f32 0.5, %v625_v52 }
 0x269   :  { %v627_v54 = vsub.f32 1.5, %v626_v53 }
 0x26a   :  { %v913_v55 = vpop.eup %912 }
 0x26b   :  { %v628_v49 = vmul.f32 %v911_v47, %v627_v54  ;;  %v634_v56 = vmul.f32 %v913_v55, %v622_v48  ;;  %vm640_vm5 = vweird.f32 %v913_v55 }
 0x26c   :  { %vm641_vm7 = vmor %vm639_vm6, %vm640_vm5 }
 0x26d   :  { %v632_v58 = vsel %vm631_vm4, %v911_v47, %v628_v49  ;;  %v635_v23 = vmul.f32 %v913_v55, %v634_v56 }
 0x26e   :  { %v643_v32 = vmul.f32 %v632_v58, %v605_v26  ;;  %v644_v60 = vmul.f32 %v632_v58, %v606_v27 }
 0x26f   :  { %v636_v62 = vmul.f32 0.5, %v635_v23 }
 0x270   :  { %v654_v63 = vmul.f32 %v650_v19, %v643_v32  ;;  %v655_v0 = vmul.f32 %v651_v57, %v644_v60 }
 0x271   :  { %v637_v38 = vsub.f32 1.5, %v636_v62 }
 0x272   :  { %v665_v2 = vadd.f32 %v661_v59, %v654_v63  ;;  %v666_v3 = vadd.f32 %v662_v61, %v655_v0 }
 0x273   :  { %v638_v39 = vmul.f32 %v913_v55, %v637_v38 }
 0x274   :  { %669 = vst [vmem:[#allocation10] sm:$0xff] %v665_v2 }
 0x275   :  { %670 = vst [vmem:[#allocation10 + $0x8] sm:$0xff] %v666_v3  ;;  %v642_v4 = vsel %vm641_vm7, %v913_v55, %v638_v39 }
 0x276   :  { %v645_v1 = vmul.f32 %v642_v4, %v607_v34  ;;  %v646_v5 = vmul.f32 %v642_v4, %v608_v35 }
 0x278   :  { %v656_v6 = vmul.f32 %v650_v19, %v645_v1  ;;  %v657_v8 = vmul.f32 %v651_v57, %v646_v5 }
 0x27a   :  { %v667_v41 = vadd.f32 %v661_v59, %v656_v6  ;;  %v668_v51 = vadd.f32 %v662_v61, %v657_v8 }
 0x27c   :  { %671 = vst [vmem:[#allocation10 + $0x10] sm:$0xff] %v667_v41 }
 0x27d   :  { %672 = vst [vmem:[#allocation10 + $0x18] sm:$0xff] %v668_v51 }
 0x27e   :  { %685 = dma.vmem_to_hbm [thread:$0]  %s678_s3, 512, %s680_s11, [#allocation4], %s1050_s12, %s1050_s12, %s1051_s13  }
 0x27f   :  { %1040 = dma.done.wait [#allocation4], 512  }
 0x280   :  { %1041 = vsyncadd [#allocation4], 4294966784 }
 0x281   :  { %690 = vsyncpa [#allocation3], 1 }
 0x282   :  { %691 = vsyncpa [#allocation6], 1 }
 0x283   :  { %692 = vsyncpa [#allocation9], 1 }
 0x284   :  { %693 = vsyncpa [#allocation4], 1 }

</bundles_post_ra>
